<compile_context>
chip_gen: v7x
topology: tpu7x:2x2x1
jax: 0.10.0
libtpu: 0.0.40
codegen_flags: <defaults>
</compile_context>

<pallas_src>
import math
import functools

import jax
import jax.numpy as jnp
from jax import lax
from jax.experimental import pallas as pl
from jax.experimental.pallas import tpu as pltpu


# --------------------------------------------------------------------------
# Stage 1: fused Q/K/V projection (computed exactly once per token).
# --------------------------------------------------------------------------
def qkv_proj_kernel(x_ref, wq_ref, wk_ref, wv_ref, q_ref, k_ref, v_ref, *, scale):
    x = x_ref[0]                                                      # (tp, D)
    q = jnp.dot(x, wq_ref[...], preferred_element_type=jnp.float32) * scale
    k = jnp.dot(x, wk_ref[...], preferred_element_type=jnp.float32)
    v = jnp.dot(x, wv_ref[...], preferred_element_type=jnp.float32)
    q_ref[0] = q.astype(q_ref.dtype)
    k_ref[0] = k.astype(k_ref.dtype)
    v_ref[0] = v.astype(v_ref.dtype)


# --------------------------------------------------------------------------
# Stage 2: flash attention over key tiles + fused output projection.
# --------------------------------------------------------------------------
def gqa_attn_kernel(q_ref, k_ref, v_ref, wo_ref, out_ref,
                    q_scr, m_scr, l_scr, acc_scr,
                    *, num_heads, num_kv_heads, head_dim, tq):
    kj = pl.program_id(2)
    n_rep = num_heads // num_kv_heads
    cdt = q_ref.dtype                         # MXU operand dtype (bf16 default)

    # ---- first key tile: regroup Q for this query tile, init softmax state.
    @pl.when(kj == 0)
    def _init():
        q_full = q_ref[0]                                             # (tq, D)
        # Stack the n_rep query heads of KV group g along rows so a single
        # scores matmul serves the whole group (taller M for the MXU).
        for g in range(num_kv_heads):
            for r in range(n_rep):
                h = g * n_rep + r
                q_scr[g, r * tq:(r + 1) * tq, :] = (
                    q_full[:, h * head_dim:(h + 1) * head_dim].astype(q_scr.dtype))
        m_scr[...] = jnp.full(m_scr.shape, -jnp.inf, m_scr.dtype)
        l_scr[...] = jnp.zeros(l_scr.shape, l_scr.dtype)
        acc_scr[...] = jnp.zeros(acc_scr.shape, acc_scr.dtype)

    k_blk = k_ref[0]                                                  # (tk, kvD)
    v_blk = v_ref[0]                                                  # (tk, kvD)

    # Contract last dims directly (q @ k^T on the MXU, no materialized transpose).
    dnums = (((1,), (1,)), ((), ()))

    # TODO(synk): for num_kv_heads >= 4 switch this static loop to
    # lax.fori_loop(..., unroll=True) with pl.ds slices to bound live ranges.
    for g in range(num_kv_heads):
        k_g = k_blk[:, g * head_dim:(g + 1) * head_dim]               # (tk, hd)
        v_g = v_blk[:, g * head_dim:(g + 1) * head_dim]               # (tk, hd)
        q_g = q_scr[g]                                                # (n_rep*tq, hd)

        s = lax.dot_general(q_g, k_g, dnums,
                            preferred_element_type=jnp.float32)       # (n_rep*tq, tk)
        m_prev = m_scr[g]
        m_new = jnp.maximum(m_prev, jnp.max(s, axis=-1, keepdims=True))
        alpha = jnp.exp(m_prev - m_new)
        p = jnp.exp(s - m_new)                                        # (n_rep*tq, tk)
        l_scr[g] = alpha * l_scr[g] + jnp.sum(p, axis=-1, keepdims=True)
        acc_scr[g] = alpha * acc_scr[g] + jnp.dot(
            p.astype(cdt), v_g, preferred_element_type=jnp.float32)
        m_scr[g] = m_new

    # TODO(synk): attention dropout is identity (eval-mode) and the optional
    # `mask` argument of the PyTorch forward is not implemented.

    # ---- last key tile: normalize and accumulate the output projection
    # per head (no (tq, D) context scratch, no extra store pass).
    @pl.when(kj == pl.num_programs(2) - 1)
    def _finalize():
        out = jnp.zeros(out_ref.shape[1:], jnp.float32)               # (tq, D)
        for g in range(num_kv_heads):
            acc_n = acc_scr[g] * pl.reciprocal(l_scr[g], approx=True)
            for r in range(n_rep):
                h = g * n_rep + r
                ctx_h = acc_n[r * tq:(r + 1) * tq, :].astype(cdt)     # (tq, hd)
                out = out + jnp.dot(
                    ctx_h, wo_ref[h * head_dim:(h + 1) * head_dim, :],
                    preferred_element_type=jnp.float32)
        out_ref[0] = out.astype(out_ref.dtype)


def _vmem_limit_bytes():
    """~75% of per-core VMEM capacity (headroom for compiler-internal scratch)."""
    try:
        cap = pltpu.get_tpu_info().vmem_capacity_bytes
        return (int(cap) * 3) // 4
    except Exception:
        return None   # fall back to the compiler's default scoped limit


def gqa_forward(x, wq, wk, wv, wo, *, num_heads, num_kv_heads=None,
                tq=None, tk=None, compute_dtype=jnp.bfloat16):
    """x: (B, S, D); weights pre-transposed to (in, out)."""
    B, S, D = x.shape
    if num_kv_heads is None:
        num_kv_heads = num_heads
    assert num_heads % num_kv_heads == 0
    head_dim = D // num_heads
    assert head_dim * num_heads == D
    # Per-head column slices of Q/K/V/W_o are only cheap when head_dim is a
    # multiple of the 128-lane width.
    assert head_dim % 128 == 0, "head_dim must be a multiple of 128 (lane width)"
    kvD = num_kv_heads * head_dim
    n_rep = num_heads // num_kv_heads
    assert wq.shape == (D, D) and wo.shape == (D, D)
    assert wk.shape == (D, kvD) and wv.shape == (D, kvD)

    # Size tiles for the 256-wide MXU (v6e/v7x): tk up to 256, n_rep*tq >= 256
    # when S allows.  Shrink tq (never tk or head_dim) if VMEM is tight (v7x).
    if tq is None:
        tq = min(S, 128)
    if tk is None:
        tk = 256 if S % 256 == 0 else min(S, 128)
    assert S % tq == 0 and S % tk == 0
    assert tq == S or tq % 8 == 0
    assert tk == S or tk % 8 == 0

    cdt = jnp.dtype(compute_dtype)
    csize = cdt.itemsize
    xc = x.astype(cdt)
    wqc, wkc, wvc, woc = (w.astype(cdt) for w in (wq, wk, wv, wo))

    vmem_limit = _vmem_limit_bytes()

    # ------------------------- Stage 1: projections -------------------------
    tp = tk
    proj_flops = 2 * B * S * D * (D + 2 * kvD)
    proj_bytes = csize * (B * S * D + D * D + 2 * D * kvD
                          + B * S * (D + 2 * kvD))
    proj_call = pl.pallas_call(
        functools.partial(qkv_proj_kernel, scale=1.0 / math.sqrt(head_dim)),
        out_shape=(jax.ShapeDtypeStruct((B, S, D), cdt),
                   jax.ShapeDtypeStruct((B, S, kvD), cdt),
                   jax.ShapeDtypeStruct((B, S, kvD), cdt)),
        grid_spec=pltpu.PrefetchScalarGridSpec(
            num_scalar_prefetch=0,
            grid=(B, S // tp),
            in_specs=[
                pl.BlockSpec((1, tp, D), lambda b, i: (b, i, 0)),
                # Constant index map -> DMA'd once; single-buffered (no point
                # double-buffering a block that never changes).
                pl.BlockSpec((D, D), lambda b, i: (0, 0),
                             pipeline_mode=pl.Buffered(1)),
                pl.BlockSpec((D, kvD), lambda b, i: (0, 0),
                             pipeline_mode=pl.Buffered(1)),
                pl.BlockSpec((D, kvD), lambda b, i: (0, 0),
                             pipeline_mode=pl.Buffered(1)),
            ],
            out_specs=(
                pl.BlockSpec((1, tp, D), lambda b, i: (b, i, 0)),
                pl.BlockSpec((1, tp, kvD), lambda b, i: (b, i, 0)),
                pl.BlockSpec((1, tp, kvD), lambda b, i: (b, i, 0)),
            ),
        ),
        compiler_params=pltpu.CompilerParams(
            dimension_semantics=("parallel", "parallel"),
            vmem_limit_bytes=vmem_limit),
        cost_estimate=pl.CostEstimate(flops=proj_flops, transcendentals=0,
                                      bytes_accessed=proj_bytes),
    )
    q, k, v = proj_call(xc, wqc, wkc, wvc)

    # --------------- Stage 2: flash attention + output projection -----------
    attn_flops = (2 * 2 * B * num_heads * S * S * head_dim     # QK^T and PV
                  + 2 * B * S * D * D)                         # fused W_o
    attn_bytes = (csize * (B * S * D                           # q (read once)
                           + 2 * (S // tq) * B * S * kvD       # k, v re-read per q-tile
                           + D * D)                            # wo
                  + B * S * D * x.dtype.itemsize)              # output

    kernel = functools.partial(
        gqa_attn_kernel, num_heads=num_heads, num_kv_heads=num_kv_heads,
        head_dim=head_dim, tq=tq)

    out = pl.pallas_call(
        kernel,
        out_shape=jax.ShapeDtypeStruct((B, S, D), x.dtype),
        grid_spec=pltpu.PrefetchScalarGridSpec(
            num_scalar_prefetch=0,
            grid=(B, S // tq, S // tk),
            in_specs=[
                # Projected Q rows for this query tile (constant across kj).
                pl.BlockSpec((1, tq, D), lambda b, qi, kj: (b, qi, 0)),
                # Projected K/V tiles streamed over the reduction axis.
                pl.BlockSpec((1, tk, kvD), lambda b, qi, kj: (b, kj, 0)),
                pl.BlockSpec((1, tk, kvD), lambda b, qi, kj: (b, kj, 0)),
                # W_o: constant index, single-buffered.
                # TODO(synk): for very large D on v7x, stream W_o K-slices from
                # HBM (memory_space=pl.ANY + manual DMA) instead of keeping it
                # resident.
                pl.BlockSpec((D, D), lambda b, qi, kj: (0, 0),
                             pipeline_mode=pl.Buffered(1)),
            ],
            out_specs=pl.BlockSpec((1, tq, D), lambda b, qi, kj: (b, qi, 0)),
            scratch_shapes=[
                pltpu.VMEM((num_kv_heads, n_rep * tq, head_dim), cdt),          # grouped Q
                pltpu.VMEM((num_kv_heads, n_rep * tq, 1), jnp.float32),         # running max
                pltpu.VMEM((num_kv_heads, n_rep * tq, 1), jnp.float32),         # running sum
                pltpu.VMEM((num_kv_heads, n_rep * tq, head_dim), jnp.float32),  # ctx accum
            ],
        ),
        compiler_params=pltpu.CompilerParams(
            dimension_semantics=("parallel", "parallel", "arbitrary"),
            vmem_limit_bytes=vmem_limit),
        cost_estimate=pl.CostEstimate(flops=attn_flops,
                                      transcendentals=B * num_heads * S * S,
                                      bytes_accessed=attn_bytes),
    )(q, k, v, woc)
    return out


def reference_gqa(x, wq, wk, wv, wo, *, num_heads, num_kv_heads):
    """Pure-JAX f32 reference mirroring the PyTorch forward (dropout = identity)."""
    B, S, D = x.shape
    head_dim = D // num_heads
    n_rep = num_heads // num_kv_heads

    q = x @ wq
    k = x @ wk
    v = x @ wv
    q = q.reshape(B, S, num_heads, head_dim)
    k = k.reshape(B, S, num_kv_heads, head_dim)
    v = v.reshape(B, S, num_kv_heads, head_dim)
    if num_kv_heads < num_heads:
        k = jnp.repeat(k, n_rep, axis=2)
        v = jnp.repeat(v, n_rep, axis=2)
    q = q.transpose(0, 2, 1, 3)
    k = k.transpose(0, 2, 1, 3)
    v = v.transpose(0, 2, 1, 3)
    scores = jnp.einsum("bhqd,bhkd->bhqk", q, k) / math.sqrt(head_dim)
    attn = jax.nn.softmax(scores, axis=-1)
    ctx = jnp.einsum("bhqk,bhkd->bhqd", attn, v)
    ctx = ctx.transpose(0, 2, 1, 3).reshape(B, S, D)
    return ctx @ wo


if __name__ == "__main__":
    # Small deterministic config that still exercises the tiling:
    # 2 query tiles x 2 key tiles per batch, 2 KV groups x 2 reps, hd=128.
    B, S, D = 2, 256, 512
    num_heads = 4
    num_kv_heads = 2
    head_dim = D // num_heads            # 128
    kvD = num_kv_heads * head_dim        # 256

    key = jax.random.PRNGKey(0)
    kx, kq, kk, kv_, ko = jax.random.split(key, 5)

    x = jax.random.normal(kx, (B, S, D), dtype=jnp.float32)

    # nn.Linear(in, out, bias=False)-style init, stored pre-transposed (in, out).
    bound = 1.0 / math.sqrt(D)
    wq = jax.random.uniform(kq, (D, D), minval=-bound, maxval=bound, dtype=jnp.float32)
    wk = jax.random.uniform(kk, (D, kvD), minval=-bound, maxval=bound, dtype=jnp.float32)
    wv = jax.random.uniform(kv_, (D, kvD), minval=-bound, maxval=bound, dtype=jnp.float32)
    wo = jax.random.uniform(ko, (D, D), minval=-bound, maxval=bound, dtype=jnp.float32)

    # tk=128 so the key axis has 2 tiles and the online-softmax accumulation
    # (init / accumulate / finalize) is exercised.
    out = gqa_forward(x, wq, wk, wv, wo,
                      num_heads=num_heads, num_kv_heads=num_kv_heads,
                      tq=128, tk=128, compute_dtype=jnp.bfloat16)
    out = jax.block_until_ready(out)

    ref = reference_gqa(x, wq, wk, wv, wo,
                        num_heads=num_heads, num_kv_heads=num_kv_heads)
    assert out.shape == (B, S, D)
    # bf16 MXU operands + online softmax + approximate (EUP) reciprocal ->
    # looser tolerance vs the f32 reference.
    assert jnp.allclose(out, ref, atol=2e-2, rtol=2e-2), "mismatch vs reference"

    print("KERNEL_OK")
</pallas_src>

<mosaic_0001>
module attributes {stable_mosaic.version = 11 : i64} {
  func.func @qkv_proj_kernel(%arg0: i32, %arg1: i32, %arg2: memref<1x128x512xbf16, #tpu.memory_space<vmem>>, %arg3: memref<512x512xbf16, #tpu.memory_space<vmem>>, %arg4: memref<512x256xbf16, #tpu.memory_space<vmem>>, %arg5: memref<512x256xbf16, #tpu.memory_space<vmem>>, %arg6: memref<1x128x512xbf16, #tpu.memory_space<vmem>>, %arg7: memref<1x128x256xbf16, #tpu.memory_space<vmem>>, %arg8: memref<1x128x256xbf16, #tpu.memory_space<vmem>>) attributes {dimension_semantics = [#tpu.dimension_semantics<parallel>, #tpu.dimension_semantics<parallel>], iteration_bounds = array<i64: 2, 2>, scalar_prefetch = 0 : i64, scratch_operands = 0 : i64, tpu.core_type = #tpu.core_type<tc>, window_params = [{transform_indices = @transform_0, window_bounds = array<i64: 1, 128, 512>}, {pipeline_mode = #tpu.pipeline_mode<synchronous>, transform_indices = @transform_1, window_bounds = array<i64: 512, 512>}, {pipeline_mode = #tpu.pipeline_mode<synchronous>, transform_indices = @transform_2, window_bounds = array<i64: 512, 256>}, {pipeline_mode = #tpu.pipeline_mode<synchronous>, transform_indices = @transform_3, window_bounds = array<i64: 512, 256>}, {transform_indices = @transform_4, window_bounds = array<i64: 1, 128, 512>}, {transform_indices = @transform_5, window_bounds = array<i64: 1, 128, 256>}, {transform_indices = @transform_6, window_bounds = array<i64: 1, 128, 256>}]} {
    %c0 = arith.constant 0 : index
    %c0_0 = arith.constant 0 : index
    %c0_1 = arith.constant 0 : index
    %0 = vector.load %arg2[%c0, %c0_0, %c0_1] : memref<1x128x512xbf16, #tpu.memory_space<vmem>>, vector<1x128x512xbf16>
    %1 = vector.shape_cast %0 : vector<1x128x512xbf16> to vector<128x512xbf16>
    %c0_2 = arith.constant 0 : index
    %c0_3 = arith.constant 0 : index
    %2 = vector.load %arg3[%c0_2, %c0_3] : memref<512x512xbf16, #tpu.memory_space<vmem>>, vector<512x512xbf16>
    %cst = arith.constant dense<0.000000e+00> : vector<128x512xf32>
    %3 = tpu.matmul %1, %2, %cst {dimension_numbers = #tpu.dot_dimension_numbers<[1], [0], [0], [1], [0, 0, 1, 1], [], []>} : vector<128x512xbf16>, vector<512x512xbf16>, vector<128x512xf32> -> vector<128x512xf32>
    %cst_4 = arith.constant 0.0883883461 : f32
    %4 = vector.broadcast %cst_4 : f32 to vector<128x512xf32>
    %5 = arith.mulf %3, %4 : vector<128x512xf32>
    %c0_5 = arith.constant 0 : index
    %c0_6 = arith.constant 0 : index
    %6 = vector.load %arg4[%c0_5, %c0_6] : memref<512x256xbf16, #tpu.memory_space<vmem>>, vector<512x256xbf16>
    %cst_7 = arith.constant dense<0.000000e+00> : vector<128x256xf32>
    %7 = tpu.matmul %1, %6, %cst_7 {dimension_numbers = #tpu.dot_dimension_numbers<[1], [0], [0], [1], [0, 0, 1, 1], [], []>} : vector<128x512xbf16>, vector<512x256xbf16>, vector<128x256xf32> -> vector<128x256xf32>
    %c0_8 = arith.constant 0 : index
    %c0_9 = arith.constant 0 : index
    %8 = vector.load %arg5[%c0_8, %c0_9] : memref<512x256xbf16, #tpu.memory_space<vmem>>, vector<512x256xbf16>
    %cst_10 = arith.constant dense<0.000000e+00> : vector<128x256xf32>
    %9 = tpu.matmul %1, %8, %cst_10 {dimension_numbers = #tpu.dot_dimension_numbers<[1], [0], [0], [1], [0, 0, 1, 1], [], []>} : vector<128x512xbf16>, vector<512x256xbf16>, vector<128x256xf32> -> vector<128x256xf32>
    %10 = arith.truncf %5 : vector<128x512xf32> to vector<128x512xbf16>
    %c0_11 = arith.constant 0 : index
    %c0_12 = arith.constant 0 : index
    %c0_13 = arith.constant 0 : index
    %11 = vector.load %arg6[%c0_11, %c0_12, %c0_13] : memref<1x128x512xbf16, #tpu.memory_space<vmem>>, vector<1x128x512xbf16>
    %12 = vector.shape_cast %11 : vector<1x128x512xbf16> to vector<128x512xbf16>
    %13 = vector.shape_cast %10 : vector<128x512xbf16> to vector<1x128x512xbf16>
    tpu.vector_store %arg6[%c0_11, %c0_12, %c0_13], %13 {strides = array<i32>} : memref<1x128x512xbf16, #tpu.memory_space<vmem>>, vector<1x128x512xbf16>,
    %14 = arith.truncf %7 : vector<128x256xf32> to vector<128x256xbf16>
    %c0_14 = arith.constant 0 : index
    %c0_15 = arith.constant 0 : index
    %c0_16 = arith.constant 0 : index
    %15 = vector.load %arg7[%c0_14, %c0_15, %c0_16] : memref<1x128x256xbf16, #tpu.memory_space<vmem>>, vector<1x128x256xbf16>
    %16 = vector.shape_cast %15 : vector<1x128x256xbf16> to vector<128x256xbf16>
    %17 = vector.shape_cast %14 : vector<128x256xbf16> to vector<1x128x256xbf16>
    tpu.vector_store %arg7[%c0_14, %c0_15, %c0_16], %17 {strides = array<i32>} : memref<1x128x256xbf16, #tpu.memory_space<vmem>>, vector<1x128x256xbf16>,
    %18 = arith.truncf %9 : vector<128x256xf32> to vector<128x256xbf16>
    %c0_17 = arith.constant 0 : index
    %c0_18 = arith.constant 0 : index
    %c0_19 = arith.constant 0 : index
    %19 = vector.load %arg8[%c0_17, %c0_18, %c0_19] : memref<1x128x256xbf16, #tpu.memory_space<vmem>>, vector<1x128x256xbf16>
    %20 = vector.shape_cast %19 : vector<1x128x256xbf16> to vector<128x256xbf16>
    %21 = vector.shape_cast %18 : vector<128x256xbf16> to vector<1x128x256xbf16>
    tpu.vector_store %arg8[%c0_17, %c0_18, %c0_19], %21 {strides = array<i32>} : memref<1x128x256xbf16, #tpu.memory_space<vmem>>, vector<1x128x256xbf16>,
    return
  }
  func.func @transform_0(%arg0: i32, %arg1: i32) -> (i32, i32, i32) {
    %c0_i32 = arith.constant 0 : i32
    %c0_i32_0 = arith.constant 0 : i32
    return %arg0, %arg1, %c0_i32 : i32, i32, i32
  }
  func.func @transform_1(%arg0: i32, %arg1: i32) -> (i32, i32) {
    %c0_i32 = arith.constant 0 : i32
    %c0_i32_0 = arith.constant 0 : i32
    %c0_i32_1 = arith.constant 0 : i32
    return %c0_i32, %c0_i32_0 : i32, i32
  }
  func.func @transform_2(%arg0: i32, %arg1: i32) -> (i32, i32) {
    %c0_i32 = arith.constant 0 : i32
    %c0_i32_0 = arith.constant 0 : i32
    %c0_i32_1 = arith.constant 0 : i32
    return %c0_i32, %c0_i32_0 : i32, i32
  }
  func.func @transform_3(%arg0: i32, %arg1: i32) -> (i32, i32) {
    %c0_i32 = arith.constant 0 : i32
    %c0_i32_0 = arith.constant 0 : i32
    %c0_i32_1 = arith.constant 0 : i32
    return %c0_i32, %c0_i32_0 : i32, i32
  }
  func.func @transform_4(%arg0: i32, %arg1: i32) -> (i32, i32, i32) {
    %c0_i32 = arith.constant 0 : i32
    %c0_i32_0 = arith.constant 0 : i32
    return %arg0, %arg1, %c0_i32 : i32, i32, i32
  }
  func.func @transform_5(%arg0: i32, %arg1: i32) -> (i32, i32, i32) {
    %c0_i32 = arith.constant 0 : i32
    %c0_i32_0 = arith.constant 0 : i32
    return %arg0, %arg1, %c0_i32 : i32, i32, i32
  }
  func.func @transform_6(%arg0: i32, %arg1: i32) -> (i32, i32, i32) {
    %c0_i32 = arith.constant 0 : i32
    %c0_i32_0 = arith.constant 0 : i32
    return %arg0, %arg1, %c0_i32 : i32, i32, i32
  }
}

</mosaic_0001>

<bundles_post_ra>
// kernel: tpu_custom_call.1
= control target key start
LH: loop header
LB: loop body
LE: loop exit
PB: predicated region body
PF: predicated region fallthrough
CT: control target
= control target key end

     0   :  { %s5880_s0 = inlined_call_operand.hbm [shape: bf16[2,256,512], index: 0, kind: input, shape index: {}]   ;;  %s5881_s1 = inlined_call_operand.hbm [shape: bf16[512,512], index: 1, kind: input, shape index: {}]   ;;  %s5882_s2 = inlined_call_operand.hbm [shape: bf16[512,256], index: 2, kind: input, shape index: {}]   ;;  %s5883_s3 = inlined_call_operand.hbm [shape: bf16[512,256], index: 3, kind: input, shape index: {}]   ;;  %s5884_s4 = inlined_call_operand.hbm [shape: bf16[2,256,512], index: 4, kind: output, shape index: {0}]   ;;  %s5885_s5 = inlined_call_operand.hbm [shape: bf16[2,256,256], index: 5, kind: output, shape index: {1}]   ;;  %s5886_s6 = inlined_call_operand.hbm [shape: bf16[2,256,256], index: 6, kind: output, shape index: {2}]  }
   0x1   :  { %5898 = sst [smem:[#allocation23_spill]] %s5881_s1 }
   0x2   :  { %5899 = sst [smem:[#allocation24_spill]] %s5882_s2 }
   0x3   :  { %5900 = sst [smem:[#allocation25_spill]] %s5883_s3 }
   0x4   :  { %5901 = sst [smem:[#allocation26_spill]] %s5886_s6 }
   0x5   :  { %12 = vsyncpa [#allocation3], 0 }
   0x6   :  { %14 = vsyncpa [#allocation3 + $0x1], 0 }
   0x7   :  { %15 = vsyncpa [#allocation6], 0 }
   0x8   :  { %16 = vsyncpa [#allocation9], 0 }
   0x9   :  { %17 = vsyncpa [#allocation4], 0 }
   0xa   :  { %19 = vsyncpa [#allocation4 + $0x1], 0 }
   0xb   :  { %20 = vsyncpa [#allocation12], 0 }
   0xc   :  { %22 = vsyncpa [#allocation12 + $0x1], 0  ;;  %s5238_s21 = smov 0   ;;  %s5240_s22 = smov 0  }
   0xd   :  { %s5242_s23 = smov 0   ;;  %s5244_s24 = smov 0  }
   0xe   :  { %s5246_s25 = smov 0   ;;  %s5248_s26 = smov 0  }
   0xf   :  { %s5250_s27 = smov 0   ;;  %s5252_s28 = smov 0  }
  0x10 LB: > { %5902 = sst [smem:[#allocation19_spill]] %s5158_s21  ;;  %s5279_s29 = sadd.s32 4294967295, %s5186_s28   ;;  %s5186_s28 = sphi %s5252_s28, %s28_s28   ;;  %s5182_s27 = sphi %s5250_s27, %s5939_s27   ;;  %s5178_s26 = sphi %s5248_s26, %s5938_s26   ;;  %s5174_s25 = sphi %s5246_s25, %s5937_s25   ;;  %s5170_s24 = sphi %s5244_s24, %s5936_s24   ;;  %s5166_s23 = sphi %s5242_s23, %s5935_s23   ;;  %s5162_s22 = sphi %s5240_s22, %s5934_s22   ;;  %s5158_s21 = sphi %s5238_s21, %s5933_s21  }
  0x11   : > { %s5890_s30 = sadd.s32 4294967294, %s5186_s28   ;;  %p62_p0 = scmp.ne.s32.totalorder %s5162_s22, %s5158_s21 }
  0x12   : > { %p5887_p1 = scmp.eq.s32.totalorder %s5279_s29, 0  ;;  %p157_p3 = scmp.eq.s32.totalorder %s5890_s30, 3 }
  0x13   : > { %p3756_p5 = scmp.ge.s32.totalorder %s5186_s28, 1  ;;  %p220_p7 = scmp.lt.s32.totalorder %s5186_s28, 5 }
  0x14   : > { %p5290_p4 = por %p5887_p1, %p62_p0  ;;  %p5295_p6 = por %p157_p3, %p62_p0 }
  0x15   : > { %p5300_p8 = pnand %p3756_p5, %p220_p7  ;;  %s5188_s10 = smov [#allocation5]  }
  0x16   : > { %s5903_s7 = scalar_select %p5290_p4, 1, 0 }
  0x17   : > { %s5904_s8 = scalar_select %p5295_p6, 1, 0 }
  0x18   : > { %s5906_s9 = scalar_select %p5300_p8, 1, 0 }
  0x19   : > { %5905 = sst [smem:[#allocation20_spill]] %s5904_s8  ;;  %s232_s11 = sshll.u32 %s5188_s10, 4  ;;  %s233_s11 = int_to_ptr.vmem [resolvable:$true] %s232_s11 }
  0x1a   : > { %p4359_p9 = pneg %p5300_p8  ;;  %s5189_s13 = smov [#allocation7]  }
  0x1b   : > { %s245_s14 = sshll.u32 %s5189_s13, 4  ;;  %s5908_s1 = sld [smem:[#allocation23_spill]]  ;;  %s5312_s14 = int_to_ptr.vmem [resolvable:$true] %s245_s14 }
  0x1c   : > { %p5308_p10 = pnand %p4359_p9, %p5887_p1 }
  0x1e   : > { %p5322_p12 = pneg %p5308_p10 }
  0x21   : > { %s4906_s17 = scalar_lea.hbm %s5908_s1, 16384 }
  0x22   : > { %p4907_p11 = scmp.ne.s32.totalorder %s5908_s1, %s4906_s17  ;;  %p4913_p3 = scmp.lt.u32.totalorder %s4906_s17, %s5908_s1 }
  0x24   : > { %p4909_p13 = pnand %p5322_p12, %p4907_p11 }
  0x26   : > { %p4910_p0 = pneg %p4909_p13 }
  0x28   : > { %p4915_p5 = pnand %p4913_p3, %p4910_p0 }
  0x2a   : > { %4918 = shalt.err (!%p4915_p5)
}
  0x2b   : > { %s4919_s15 = scalar_lea.vmem %s233_s11, 16384  ;;  %p4927_p2 = scmp.lt.s32.totalorder %s233_s11, %s233_s11 }
  0x2c   : > { %p4920_p7 = scmp.ne.s32.totalorder %s233_s11, %s4919_s15  ;;  %p4928_p6 = scmp.lt.s32.totalorder %s4919_s15, %s4919_s15 }
  0x2e   : > { %p4922_p9 = pnand %p4920_p7, %p5322_p12  ;;  %p4929_p4 = por %p4928_p6, %p4927_p2 }
  0x30   : > { %p4923_p1 = pneg %p4922_p9 }
  0x32   : > { %p4930_p8 = pnand %p4929_p4, %p4923_p1 }
  0x34   : > { %4933 = shalt.err (!%p4930_p8)
}
  0x35   : > { %s5894_s16 = smov 256   ;;  %s5895_s18 = smov 16  }
  0x36   : > { %4362 = dma.hbm_to_vmem [thread:$0]  (!%p5308_p10), %s5908_s1, 16384, %s233_s11, [#allocation6], %s5894_s16, %s5894_s16, %s5895_s18  }
  0x37   : > { %s5910_s2 = sld [smem:[#allocation24_spill]] }
  0x3d   : > { %s4934_s30 = scalar_lea.hbm %s5910_s2, 8192 }
  0x3e   : > { %p4935_p1 = scmp.ne.s32.totalorder %s5910_s2, %s4934_s30  ;;  %p4941_p6 = scmp.lt.u32.totalorder %s4934_s30, %s5910_s2 }
  0x40   : > { %p4937_p2 = pnand %p4935_p1, %p5322_p12 }
  0x42   : > { %p4938_p4 = pneg %p4937_p2 }
  0x44   : > { %p4943_p8 = pnand %p4941_p6, %p4938_p4 }
  0x46   : > { %4946 = shalt.err (!%p4943_p8)
}
  0x47   : > { %s4947_s11 = scalar_lea.vmem %s5312_s14, 8192  ;;  %p4955_p3 = scmp.lt.s32.totalorder %s5312_s14, %s5312_s14 }
  0x48   : > { %p4948_p11 = scmp.ne.s32.totalorder %s5312_s14, %s4947_s11  ;;  %p4956_p5 = scmp.lt.s32.totalorder %s4947_s11, %s4947_s11 }
  0x4a   : > { %p4950_p13 = pnand %p4948_p11, %p5322_p12  ;;  %p4957_p7 = por %p4956_p5, %p4955_p3 }
  0x4c   : > { %p4951_p0 = pneg %p4950_p13 }
  0x4e   : > { %p4958_p9 = pnand %p4957_p7, %p4951_p0 }
  0x50   : > { %4961 = shalt.err (!%p4958_p9)
}
  0x51   : > { %s5192_s8 = smov 128   ;;  %s5193_s6 = smov 8  }
  0x52   : > { %4365 = dma.hbm_to_vmem [thread:$0]  (!%p5308_p10), %s5910_s2, 8192, %s5312_s14, [#allocation6], %s5192_s8, %s5192_s8, %s5193_s6  }
  0x53   : > { %s5194_s17 = smov [#allocation8]   ;;  %s5911_s3 = sld [smem:[#allocation25_spill]] }
  0x54   : > { %s258_s19 = sshll.u32 %s5194_s17, 4  ;;  %s259_s19 = int_to_ptr.vmem [resolvable:$true] %s258_s19 }
  0x59   : > { %s4962_s15 = scalar_lea.hbm %s5911_s3, 8192 }
  0x5a   : > { %p4963_p1 = scmp.ne.s32.totalorder %s5911_s3, %s4962_s15  ;;  %p4969_p6 = scmp.lt.u32.totalorder %s4962_s15, %s5911_s3 }
  0x5c   : > { %p4965_p2 = pnand %p4963_p1, %p5322_p12 }
  0x5e   : > { %p4966_p4 = pneg %p4965_p2 }
  0x60   : > { %p4971_p8 = pnand %p4969_p6, %p4966_p4 }
  0x62   : > { %4974 = shalt.err (!%p4971_p8)
}
  0x63   : > { %s4975_s14 = scalar_lea.vmem %s259_s19, 8192  ;;  %p4983_p3 = scmp.lt.s32.totalorder %s259_s19, %s259_s19 }
  0x64   : > { %p4976_p11 = scmp.ne.s32.totalorder %s259_s19, %s4975_s14  ;;  %p4984_p5 = scmp.lt.s32.totalorder %s4975_s14, %s4975_s14 }
  0x66   : > { %p4978_p13 = pnand %p4976_p11, %p5322_p12  ;;  %p4985_p7 = por %p4984_p5, %p4983_p3 }
  0x68   : > { %p4979_p0 = pneg %p4978_p13 }
  0x6a   : > { %p4986_p9 = pnand %p4985_p7, %p4979_p0 }
  0x6c   : > { %4989 = shalt.err (!%p4986_p9)
}
  0x6d   : > { %4368 = dma.hbm_to_vmem [thread:$0]  (!%p5308_p10), %s5911_s3, 8192, %s259_s19, [#allocation9], %s5192_s8, %s5192_s8, %s5193_s6  }
  0x6e   : > { %s37_s1 = sadd.s32 1, %s5178_s26  ;;  %s40_s12 = sadd.s32 1, %s5182_s27 }
  0x6f   : > { %p38_p12 = scmp.ge.s32.totalorder %s37_s1, 2  ;;  %s49_s20 = sadd.s32 1, %s5166_s23 }
  0x70   : > { %p56_p1 = scmp.ne.s32.totalorder %s5166_s23, %s5162_s22  ;;  %p57_p2 = scmp.eq.s32.totalorder %s5186_s28, 0 }
  0x71   : > { %s5941_s1 = smov (%p38_p12, %s37_s1), 0  ;;  %s5943_s12 = smov (!%p38_p12, %s40_s12), %s5182_s27 }
  0x72   : > { %5912 = sst [smem:[#allocation21_spill]] %s5941_s1  ;;  %s45_s18 = ssub.s32 %s5178_s26, %s5941_s1 }
  0x73   : > { %p42_p4 = scmp.ge.s32.totalorder %s5943_s12, 2  ;;  %p5913_p6 = scmp.eq.s32.totalorder %s5279_s29, 3 }
  0x74   : > { %p5399_p10 = por %p57_p2, %p56_p1  ;;  %p4386_p11 = scmp.lt.s32.totalorder %s5186_s28, 4 }
  0x75   : > { %p5395_p8 = por %p5913_p6, %p56_p1  ;;  %s5945_s12 = smov (%p42_p4, %s5943_s12), 0 }
  0x76   : > { %5916 = sst [smem:[#allocation22_spill]] %s5945_s12  ;;  %s272_s6 = sand.u32 1, %s5166_s23  }
  0x77   : > { %s4143_s17 = sshll.u32 %s5178_s26, 6  ;;  %s44_s19 = ssub.s32 %s5182_s27, %s5945_s12 }
  0x78   : > { %s46_s10 = sor.u32 %s45_s18, %s44_s19  ;;  %s3761_s13 = sshll.u32 %s272_s6, 8 }
  0x79   : > { %p47_p13 = scmp.eq.s32.totalorder %s46_s10, 0  ;;  %s3764_s15 = sshll.u32 %s5182_s27, 7 }
  0x7a   : > { %s276_s11 = scalar_lea.vmem [#allocation2], %s3761_s13  ;;  %s283_s21 = sadd.s32 %s4143_s17, %s3764_s15 }
  0x7b   : > { %s286_s14 = sshll.u32 %s276_s11, 4  ;;  %s3765_s2 = sshll.u32 %s283_s21, 6  ;;  %s5414_s14 = int_to_ptr.vmem [resolvable:$true] %s286_s14 }
  0x7c   : > { %s5412_s16 = scalar_select %p47_p13, %s5166_s23, %s49_s20  }
  0x7d   : > { %p5420_p0 = pnand %p4386_p11, %p5399_p10  ;;  %s5427_s18 = scalar_lea.hbm %s5880_s0, %s3765_s2 }
  0x7e   : > { %s5429_s20 = scalar_lea.sflag [#allocation3], %s272_s6  ;;  %s4990_s17 = scalar_lea.hbm %s5427_s18, 4096 }
  0x7f   : > { %p4991_p3 = scmp.ne.s32.totalorder %s5427_s18, %s4990_s17  ;;  %p4992_p5 = pneg %p5420_p0 }
  0x80   : > { %s4995_s12 = scalar_lea.hbm %s5880_s0, 16384  ;;  %p4996_p12 = scmp.lt.u32.totalorder %s5427_s18, %s5880_s0 }
  0x81   : > { %p4993_p7 = pnand %p4992_p5, %p4991_p3  ;;  %p4997_p1 = scmp.lt.u32.totalorder %s4995_s12, %s4990_s17 }
  0x82   : > { %p4999_p4 = scmp.lt.u32.totalorder %s4990_s17, %s5427_s18 }
  0x83   : > { %p4994_p9 = pneg %p4993_p7  ;;  %p4998_p2 = por %p4997_p1, %p4996_p12 }
  0x85   : > { %p5000_p6 = por %p4999_p4, %p4998_p2 }
  0x87   : > { %p5001_p10 = pnand %p5000_p6, %p4994_p9 }
  0x89   : > { %5004 = shalt.err (!%p5001_p10)
}
  0x8a   : > { %s5005_s6 = scalar_lea.vmem %s5414_s14, 4096  ;;  %s5195_s10 = smov [#allocation2]  }
  0x8b   : > { %p5006_p11 = scmp.ne.s32.totalorder %s5414_s14, %s5005_s6  ;;  %s5010_s13 = sshll.u32 %s5195_s10, 4  ;;  %s5011_s13 = int_to_ptr.vmem [resolvable:$false] %s5010_s13 }
  0x8c   : > { %s5012_s15 = scalar_lea.vmem %s5011_s13, 8192  ;;  %p5013_p7 = scmp.lt.s32.totalorder %s5414_s14, %s5011_s13 }
  0x8d   : > { %p5008_p13 = pnand %p5006_p11, %p4992_p5  ;;  %p5014_p12 = scmp.lt.s32.totalorder %s5012_s15, %s5005_s6 }
  0x8f   : > { %p5009_p3 = pneg %p5008_p13  ;;  %p5015_p1 = por %p5014_p12, %p5013_p7 }
  0x91   : > { %p5016_p2 = pnand %p5015_p1, %p5009_p3 }
  0x93   : > { %5019 = shalt.err (!%p5016_p2)
}
  0x94   : > { %s5918_s11 = smov 16   ;;  %s5919_s21 = smov 256  }
  0x95   : > { %4372 = dma.hbm_to_vmem [thread:$0]  (!%p5420_p0), %s5427_s18, 4096, %s5414_s14, %s5429_s20, %s5919_s21, %s5919_s21, %s5918_s11  }
  0x96   : > { %p5920_p5 = scmp.ne.s32.totalorder %s5906_s9, 0 }
  0x97   : > { %s5463_s17 = sand.u32 (!%p5920_p5), 1, %s5162_s22   ;;  %p5921_p9 = scmp.ne.s32.totalorder (!%p5920_p5), %s5903_s7, 0 }
  0x98   : > { %298 = sbr.rel (%p5920_p5) target bundleno = 733 (0x2dd), region = 36  ;;  %s3767_s8 = sshll.u32 (!%p5920_p5), %s5463_s17, 8 }
  0x99   : > { %s301_s1 = scalar_lea.sflag (!%p5920_p5), [#allocation3], %s5463_s17  ;;  %s5469_s3 = scalar_lea.vmem (!%p5920_p5), [#allocation2], %s3767_s8 }
  0x9f   : > { %5137 = dma.done.wait (%p5921_p9), %s301_s1, 4096  }
  0xa0   : > { %5139 = vsyncadd (%p5921_p9), %s301_s1, 4294963200  ;;  %p5922_p0 = scmp.eq.s32.totalorder %s5279_s29, 0 }
  0xa2   : > { %5141 = dma.done.wait (%p5922_p0), [#allocation6], 24576   ;;  %p5923_p4 = pmov %p5922_p0 }
  0xa3   : > { %p5924_p6 = pmov %p5922_p0 }
  0xa4   : > { %5143 = vsyncadd (%p5923_p4), [#allocation6], 4294942720 }
  0xa5   : > { %5145 = dma.done.wait (%p5924_p6), [#allocation9], 8192   ;;  %p5925_p10 = pmov %p5922_p0 }
  0xa6   : > { %v4466_v0 = vld [vmem:[#allocation5 + $0x4] ss:$16 sps:$4 sm:$0xff]   ;;  %v4468_v1 = vld [vmem:[#allocation5 + $0xc] ss:$16 sps:$4 sm:$0xff]   ;;  %v4470_v2 = vld [vmem:[#allocation5] ss:$16 sps:$4 sm:$0xff]  }
  0xa7   : > { %5147 = vsyncadd (%p5925_p10), [#allocation9], 4294959104  ;;  %1319 = vmatprep.subr.bf16.mxu0 %v4466_v0  ;;  %v4471_v3 = vld [vmem:[#allocation5 + $0x8] ss:$16 sps:$4 sm:$0xff]   ;;  %1545 = vmatprep.subr.bf16.mxu1 %v4468_v1  ;;  %v4472_v4 = vld [vmem:[#allocation5 + $0x24] ss:$16 sps:$4 sm:$0xff]  }
  0xa8   : > { %1320 = vmatpush1.bf16.msra.mxu0 %v4470_v2  ;;  %1546 = vmatpush1.bf16.msra.mxu1 %v4471_v3  ;;  %v4474_v5 = vld [vmem:[#allocation5 + $0x2c] ss:$16 sps:$4 sm:$0xff]   ;;  %v4476_v6 = vld [vmem:[#allocation5 + $0x20] ss:$16 sps:$4 sm:$0xff]   ;;  %v4477_v7 = vld [vmem:[#allocation5 + $0x28] ss:$16 sps:$4 sm:$0xff]  }
  0xa9   : > { %1321 = vmatprep.subr.bf16.mxu0 %v4472_v4  ;;  %1547 = vmatprep.subr.bf16.mxu1 %v4474_v5  ;;  %v4478_v8 = vld [vmem:[#allocation5 + $0x44] ss:$16 sps:$4 sm:$0xff]   ;;  %v4480_v9 = vld [vmem:[#allocation5 + $0x4c] ss:$16 sps:$4 sm:$0xff]   ;;  %v4482_v10 = vld [vmem:[#allocation5 + $0x40] ss:$16 sps:$4 sm:$0xff]  }
  0xaa   : > { %v4483_v11 = vld [vmem:[#allocation5 + $0x48] ss:$16 sps:$4 sm:$0xff]   ;;  %v4484_v12 = vld [vmem:[#allocation5 + $0x64] ss:$16 sps:$4 sm:$0xff]   ;;  %v4486_v13 = vld [vmem:[#allocation5 + $0x6c] ss:$16 sps:$4 sm:$0xff]  }
  0xab   : > { %v4488_v14 = vld [vmem:[#allocation5 + $0x60] ss:$16 sps:$4 sm:$0xff]   ;;  %v4489_v15 = vld [vmem:[#allocation5 + $0x68] ss:$16 sps:$4 sm:$0xff]   ;;  %v4490_v16 = vld [vmem:[#allocation5 + $0x84] ss:$16 sps:$4 sm:$0xff]  }
  0xac   : > { %1322 = vmatpush1.bf16.msra.mxu0 %v4476_v6  ;;  %1548 = vmatpush1.bf16.msra.mxu1 %v4477_v7  ;;  %v4492_v17 = vld [vmem:[#allocation5 + $0x8c] ss:$16 sps:$4 sm:$0xff]   ;;  %v4494_v18 = vld [vmem:[#allocation5 + $0x80] ss:$16 sps:$4 sm:$0xff]   ;;  %v4495_v19 = vld [vmem:[#allocation5 + $0x88] ss:$16 sps:$4 sm:$0xff]  }
  0xad   : > { %1323 = vmatprep.subr.bf16.mxu0 %v4478_v8  ;;  %1549 = vmatprep.subr.bf16.mxu1 %v4480_v9  ;;  %v4496_v20 = vld [vmem:[#allocation5 + $0xa4] ss:$16 sps:$4 sm:$0xff]   ;;  %v4498_v21 = vld [vmem:[#allocation5 + $0xac] ss:$16 sps:$4 sm:$0xff]   ;;  %v4500_v22 = vld [vmem:[#allocation5 + $0xa0] ss:$16 sps:$4 sm:$0xff]  }
  0xae   : > { %v4501_v23 = vld [vmem:[#allocation5 + $0xa8] ss:$16 sps:$4 sm:$0xff]   ;;  %v4502_v24 = vld [vmem:[#allocation5 + $0xc4] ss:$16 sps:$4 sm:$0xff]   ;;  %v4504_v25 = vld [vmem:[#allocation5 + $0xcc] ss:$16 sps:$4 sm:$0xff]  }
  0xaf   : > { %v4506_v26 = vld [vmem:[#allocation5 + $0xc0] ss:$16 sps:$4 sm:$0xff]   ;;  %v4507_v27 = vld [vmem:[#allocation5 + $0xc8] ss:$16 sps:$4 sm:$0xff]   ;;  %v4508_v28 = vld [vmem:[#allocation5 + $0xe4] ss:$16 sps:$4 sm:$0xff]  }
  0xb0   : > { %1324 = vmatpush1.bf16.msra.mxu0 %v4482_v10  ;;  %1550 = vmatpush1.bf16.msra.mxu1 %v4483_v11  ;;  %v4510_v29 = vld [vmem:[#allocation5 + $0xec] ss:$16 sps:$4 sm:$0xff]   ;;  %v4512_v30 = vld [vmem:[#allocation5 + $0xe0] ss:$16 sps:$4 sm:$0xff]   ;;  %v4513_v31 = vld [vmem:[#allocation5 + $0xe8] ss:$16 sps:$4 sm:$0xff]  }
  0xb1   : > { %1325 = vmatprep.subr.bf16.mxu0 %v4484_v12  ;;  %1551 = vmatprep.subr.bf16.mxu1 %v4486_v13  ;;  %v4514_v32 = vld [vmem:[#allocation5 + $0x104] ss:$16 sps:$4 sm:$0xff]   ;;  %v4516_v33 = vld [vmem:[#allocation5 + $0x10c] ss:$16 sps:$4 sm:$0xff]   ;;  %v4518_v34 = vld [vmem:[#allocation5 + $0x100] ss:$16 sps:$4 sm:$0xff]  }
  0xb2   : > { %v4519_v35 = vld [vmem:[#allocation5 + $0x108] ss:$16 sps:$4 sm:$0xff]   ;;  %v4520_v36 = vld [vmem:[#allocation5 + $0x124] ss:$16 sps:$4 sm:$0xff]   ;;  %v4522_v37 = vld [vmem:[#allocation5 + $0x12c] ss:$16 sps:$4 sm:$0xff]  }
  0xb3   : > { %v4524_v38 = vld [vmem:[#allocation5 + $0x120] ss:$16 sps:$4 sm:$0xff]   ;;  %v4525_v39 = vld [vmem:[#allocation5 + $0x128] ss:$16 sps:$4 sm:$0xff]   ;;  %v4526_v40 = vld [vmem:[#allocation5 + $0x144] ss:$16 sps:$4 sm:$0xff]  }
  0xb4   : > { %1326 = vmatpush1.bf16.msra.mxu0 %v4488_v14  ;;  %1552 = vmatpush1.bf16.msra.mxu1 %v4489_v15  ;;  %v4528_v41 = vld [vmem:[#allocation5 + $0x14c] ss:$16 sps:$4 sm:$0xff]   ;;  %v4530_v42 = vld [vmem:[#allocation5 + $0x140] ss:$16 sps:$4 sm:$0xff]   ;;  %v4531_v43 = vld [vmem:[#allocation5 + $0x148] ss:$16 sps:$4 sm:$0xff]  }
  0xb5   : > { %1327 = vmatprep.subr.bf16.mxu0 %v4490_v16  ;;  %1553 = vmatprep.subr.bf16.mxu1 %v4492_v17  ;;  %v4532_v44 = vld [vmem:[#allocation5 + $0x164] ss:$16 sps:$4 sm:$0xff]   ;;  %v4534_v45 = vld [vmem:[#allocation5 + $0x16c] ss:$16 sps:$4 sm:$0xff]   ;;  %v4536_v46 = vld [vmem:[#allocation5 + $0x160] ss:$16 sps:$4 sm:$0xff]  }
  0xb6   : > { %v4537_v47 = vld [vmem:[#allocation5 + $0x168] ss:$16 sps:$4 sm:$0xff]   ;;  %v4562_v48 = vld [vmem:[%s5469_s3 + $0x4] ss:$16 sps:$4 sm:$0xff]   ;;  %v4540_v50 = vld [vmem:[#allocation5 + $0x18c] ss:$16 sps:$4 sm:$0xff]  }
  0xb7   : > { %v4538_v49 = vld [vmem:[#allocation5 + $0x184] ss:$16 sps:$4 sm:$0xff]   ;;  %1351 = vmatprep.mubr.bf16.mxu0 %v4562_v48  ;;  %1577 = vmatprep.mubr.bf16.mxu1 %v4562_v48  ;;  %v4542_v51 = vld [vmem:[#allocation5 + $0x180] ss:$16 sps:$4 sm:$0xff]   ;;  %v4543_v52 = vld [vmem:[#allocation5 + $0x188] ss:$16 sps:$4 sm:$0xff]  }
  0xb8   : > { %1328 = vmatpush1.bf16.msra.mxu0 %v4494_v18  ;;  %1554 = vmatpush1.bf16.msra.mxu1 %v4495_v19  ;;  %v4544_v53 = vld [vmem:[#allocation5 + $0x1a4] ss:$16 sps:$4 sm:$0xff]   ;;  %v4546_v54 = vld [vmem:[#allocation5 + $0x1ac] ss:$16 sps:$4 sm:$0xff]   ;;  %v4548_v55 = vld [vmem:[#allocation5 + $0x1a0] ss:$16 sps:$4 sm:$0xff]  }
  0xb9   : > { %1329 = vmatprep.subr.bf16.mxu0 %v4496_v20  ;;  %1555 = vmatprep.subr.bf16.mxu1 %v4498_v21  ;;  %v4549_v56 = vld [vmem:[#allocation5 + $0x1a8] ss:$16 sps:$4 sm:$0xff]   ;;  %v4550_v57 = vld [vmem:[#allocation5 + $0x1c4] ss:$16 sps:$4 sm:$0xff]   ;;  %v4552_v58 = vld [vmem:[#allocation5 + $0x1cc] ss:$16 sps:$4 sm:$0xff]  }
  0xba   : > { %v4554_v59 = vld [vmem:[#allocation5 + $0x1c0] ss:$16 sps:$4 sm:$0xff]   ;;  %v4555_v60 = vld [vmem:[#allocation5 + $0x1c8] ss:$16 sps:$4 sm:$0xff]   ;;  %v4556_v61 = vld [vmem:[#allocation5 + $0x1e4] ss:$16 sps:$4 sm:$0xff]  }
  0xbb   : > { %v4558_v62 = vld [vmem:[#allocation5 + $0x1ec] ss:$16 sps:$4 sm:$0xff]   ;;  %v4560_v63 = vld [vmem:[#allocation5 + $0x1e0] ss:$16 sps:$4 sm:$0xff]   ;;  %v4561_v0 = vld [vmem:[#allocation5 + $0x1e8] ss:$16 sps:$4 sm:$0xff]  }
  0xbc   : > { %1330 = vmatpush1.bf16.msra.mxu0 %v4500_v22  ;;  %1556 = vmatpush1.bf16.msra.mxu1 %v4501_v23  ;;  %v4567_v1 = vld [vmem:[#allocation5 + $0x204] ss:$16 sps:$4 sm:$0xff]   ;;  %v4570_v2 = vld [vmem:[#allocation5 + $0x20c] ss:$16 sps:$4 sm:$0xff]   ;;  %v4564_v3 = vld [vmem:[%s5469_s3] ss:$16 sps:$4 sm:$0xff]  }
  0xbd   : > { %1331 = vmatprep.subr.bf16.mxu0 %v4502_v24  ;;  %1557 = vmatprep.subr.bf16.mxu1 %v4504_v25  ;;  %v4565_v4 = vld [vmem:[#allocation5 + $0x200] ss:$16 sps:$4 sm:$0xff]   ;;  %v4568_v5 = vld [vmem:[#allocation5 + $0x208] ss:$16 sps:$4 sm:$0xff]   ;;  %v4573_v6 = vld [vmem:[#allocation5 + $0x224] ss:$16 sps:$4 sm:$0xff]  }
  0xbe   : > { %v4576_v7 = vld [vmem:[#allocation5 + $0x22c] ss:$16 sps:$4 sm:$0xff]   ;;  %v4577_v8 = vld [vmem:[%s5469_s3 + $0x24] ss:$16 sps:$4 sm:$0xff]   ;;  %v4571_v9 = vld [vmem:[#allocation5 + $0x220] ss:$16 sps:$4 sm:$0xff]  }
  0xbf   : > { %v4574_v10 = vld [vmem:[#allocation5 + $0x228] ss:$16 sps:$4 sm:$0xff]   ;;  %v4582_v11 = vld [vmem:[#allocation5 + $0x244] ss:$16 sps:$4 sm:$0xff]   ;;  %v4585_v12 = vld [vmem:[#allocation5 + $0x24c] ss:$16 sps:$4 sm:$0xff]  }
  0xc0   : > { %1332 = vmatpush1.bf16.msra.mxu0 %v4506_v26  ;;  %1558 = vmatpush1.bf16.msra.mxu1 %v4507_v27  ;;  %v4579_v13 = vld [vmem:[%s5469_s3 + $0x20] ss:$16 sps:$4 sm:$0xff]   ;;  %v4583_v15 = vld [vmem:[#allocation5 + $0x248] ss:$16 sps:$4 sm:$0xff]   ;;  %v4588_v16 = vld [vmem:[#allocation5 + $0x264] ss:$16 sps:$4 sm:$0xff]  }
  0xc1   : > { %1333 = vmatprep.subr.bf16.mxu0 %v4508_v28  ;;  %1559 = vmatprep.subr.bf16.mxu1 %v4510_v29  ;;  %v4580_v14 = vld [vmem:[#allocation5 + $0x240] ss:$16 sps:$4 sm:$0xff]   ;;  %v4591_v17 = vld [vmem:[#allocation5 + $0x26c] ss:$16 sps:$4 sm:$0xff]   ;;  %v4592_v18 = vld [vmem:[%s5469_s3 + $0x44] ss:$16 sps:$4 sm:$0xff]  }
  0xc2   : > { %v4586_v19 = vld [vmem:[#allocation5 + $0x260] ss:$16 sps:$4 sm:$0xff]   ;;  %v4589_v20 = vld [vmem:[#allocation5 + $0x268] ss:$16 sps:$4 sm:$0xff]   ;;  %v4597_v21 = vld [vmem:[#allocation5 + $0x284] ss:$16 sps:$4 sm:$0xff]  }
  0xc3   : > { %v4600_v22 = vld [vmem:[#allocation5 + $0x28c] ss:$16 sps:$4 sm:$0xff]   ;;  %v4594_v23 = vld [vmem:[%s5469_s3 + $0x40] ss:$16 sps:$4 sm:$0xff]   ;;  %v4598_v25 = vld [vmem:[#allocation5 + $0x288] ss:$16 sps:$4 sm:$0xff]  }
  0xc4   : > { %1334 = vmatpush1.bf16.msra.mxu0 %v4512_v30  ;;  %1560 = vmatpush1.bf16.msra.mxu1 %v4513_v31  ;;  %v4595_v24 = vld [vmem:[#allocation5 + $0x280] ss:$16 sps:$4 sm:$0xff]   ;;  %v4603_v26 = vld [vmem:[#allocation5 + $0x2a4] ss:$16 sps:$4 sm:$0xff]   ;;  %v4606_v27 = vld [vmem:[#allocation5 + $0x2ac] ss:$16 sps:$4 sm:$0xff]  }
  0xc5   : > { %1335 = vmatprep.subr.bf16.mxu0 %v4514_v32  ;;  %1561 = vmatprep.subr.bf16.mxu1 %v4516_v33  ;;  %v4607_v28 = vld [vmem:[%s5469_s3 + $0x64] ss:$16 sps:$4 sm:$0xff]   ;;  %v4601_v29 = vld [vmem:[#allocation5 + $0x2a0] ss:$16 sps:$4 sm:$0xff]   ;;  %v4604_v30 = vld [vmem:[#allocation5 + $0x2a8] ss:$16 sps:$4 sm:$0xff]  }
  0xc6   : > { %v4612_v31 = vld [vmem:[#allocation5 + $0x2c4] ss:$16 sps:$4 sm:$0xff]   ;;  %v4615_v32 = vld [vmem:[#allocation5 + $0x2cc] ss:$16 sps:$4 sm:$0xff]   ;;  %v5491_v33 = vld [vmem:[%s5469_s3 + $0x60] ss:$16 sps:$4 sm:$0xff]  }
  0xc7   : > { %v5504_v48 = vld [vmem:[%s5469_s3 + $0xa4] ss:$16 sps:$4 sm:$0xff]   ;;  %s5674_s7 = scalar_lea.vmem [#allocation10], %s3767_s8  ;;  %s4208_s9 = sshll.u32 %s5170_s24, 6 }
  0xc8   : > { %1336 = vmatpush1.bf16.msra.mxu0 %v4518_v34  ;;  %1562 = vmatpush1.bf16.msra.mxu1 %v4519_v35  ;;  %v4610_v34 = vld [vmem:[#allocation5 + $0x2c0] ss:$16 sps:$4 sm:$0xff]   ;;  %v4613_v35 = vld [vmem:[#allocation5 + $0x2c8] ss:$16 sps:$4 sm:$0xff]   ;;  %s4131_s14 = sshll.u32 %s5174_s25, 7  ;;  %s3530_s18 = sshll.u32 %s5674_s7, 4  ;;  %s5711_s18 = int_to_ptr.vmem [resolvable:$true] %s3530_s18 }
  0xc9   : > { %1337 = vmatprep.subr.bf16.mxu0 %v4520_v36  ;;  %1563 = vmatprep.subr.bf16.mxu1 %v4522_v37  ;;  %v4618_v36 = vld [vmem:[#allocation5 + $0x2e4] ss:$16 sps:$4 sm:$0xff]   ;;  %v4621_v37 = vld [vmem:[#allocation5 + $0x2ec] ss:$16 sps:$4 sm:$0xff]   ;;  %s3527_s20 = sadd.s32 %s4208_s9, %s4131_s14  ;;  %s3504_s10 = scalar_lea.sflag [#allocation4], %s5463_s17 }
  0xca   : > { %s4132_s12 = sshll.u32 %s3527_s20, 6  ;;  %s5020_s13 = scalar_lea.vmem %s5711_s18, 4096 }
  0xcb   : > { %s5716_s6 = scalar_lea.hbm %s5884_s4, %s4132_s12  ;;  %p5021_p11 = scmp.ne.s32.totalorder %s5711_s18, %s5020_s13 }
  0xcc   : > { %1338 = vmatpush1.bf16.msra.mxu0 %v4524_v38  ;;  %1564 = vmatpush1.bf16.msra.mxu1 %v4525_v39  ;;  %v5494_v38 = vld [vmem:[%s5469_s3 + $0x84] ss:$16 sps:$4 sm:$0xff]   ;;  %v4616_v39 = vld [vmem:[#allocation5 + $0x2e0] ss:$16 sps:$4 sm:$0xff]   ;;  %s5196_s15 = smov [#allocation10]  }
  0xcd   : > { %1339 = vmatprep.subr.bf16.mxu0 %v4526_v40  ;;  %1565 = vmatprep.subr.bf16.mxu1 %v4528_v41  ;;  %v4619_v40 = vld [vmem:[#allocation5 + $0x2e8] ss:$16 sps:$4 sm:$0xff]   ;;  %v4627_v41 = vld [vmem:[#allocation5 + $0x304] ss:$16 sps:$4 sm:$0xff]   ;;  %p5022_p13 = pnand %p5021_p11, %p5395_p8  ;;  %s5024_s11 = sshll.u32 %s5196_s15, 4  ;;  %s5025_s11 = int_to_ptr.vmem [resolvable:$false] %s5024_s11 }
  0xce   : > { %s5026_s21 = scalar_lea.vmem %s5025_s11, 8192  ;;  %p5027_p7 = scmp.lt.s32.totalorder %s5711_s18, %s5025_s11 }
  0xcf   : > { %p5023_p3 = pneg %p5022_p13  ;;  %p5028_p12 = scmp.lt.s32.totalorder %s5026_s21, %s5020_s13 }
  0xd0   : > { %1340 = vmatpush1.bf16.msra.mxu0 %v4530_v42  ;;  %1566 = vmatpush1.bf16.msra.mxu1 %v4531_v43  ;;  %v4630_v42 = vld [vmem:[#allocation5 + $0x30c] ss:$16 sps:$4 sm:$0xff]   ;;  %v5501_v43 = vld [vmem:[%s5469_s3 + $0x80] ss:$16 sps:$4 sm:$0xff]  }
  0xd1   : > { %1341 = vmatprep.subr.bf16.mxu0 %v4532_v44  ;;  %1567 = vmatprep.subr.bf16.mxu1 %v4534_v45  ;;  %v4625_v44 = vld [vmem:[#allocation5 + $0x300] ss:$16 sps:$4 sm:$0xff]   ;;  %v4628_v45 = vld [vmem:[#allocation5 + $0x308] ss:$16 sps:$4 sm:$0xff]   ;;  %p5029_p1 = por %p5028_p12, %p5027_p7 }
  0xd3   : > { %p5030_p2 = pnand %p5029_p1, %p5023_p3 }
  0xd4   : > { %1342 = vmatpush1.bf16.msra.mxu0 %v4536_v46  ;;  %1568 = vmatpush1.bf16.msra.mxu1 %v4537_v47  ;;  %v4633_v46 = vld [vmem:[#allocation5 + $0x324] ss:$16 sps:$4 sm:$0xff]   ;;  %v4636_v47 = vld [vmem:[#allocation5 + $0x32c] ss:$16 sps:$4 sm:$0xff]  }
  0xd5   : > { %1343 = vmatprep.subr.bf16.mxu0 %v4538_v49  ;;  %1569 = vmatprep.subr.bf16.mxu1 %v4540_v50  ;;  %v4631_v49 = vld [vmem:[#allocation5 + $0x320] ss:$16 sps:$4 sm:$0xff]   ;;  %v4634_v50 = vld [vmem:[#allocation5 + $0x328] ss:$16 sps:$4 sm:$0xff]  }
  0xd8   : > { %1344 = vmatpush1.bf16.msra.mxu0 %v4542_v51  ;;  %1570 = vmatpush1.bf16.msra.mxu1 %v4543_v52  ;;  %v4642_v51 = vld [vmem:[#allocation5 + $0x344] ss:$16 sps:$4 sm:$0xff]   ;;  %v4645_v52 = vld [vmem:[#allocation5 + $0x34c] ss:$16 sps:$4 sm:$0xff]  }
  0xd9   : > { %1345 = vmatprep.subr.bf16.mxu0 %v4544_v53  ;;  %1571 = vmatprep.subr.bf16.mxu1 %v4546_v54  ;;  %v5511_v53 = vld [vmem:[%s5469_s3 + $0xa0] ss:$16 sps:$4 sm:$0xff]  }
  0xda   : > { %v4640_v54 = vld [vmem:[#allocation5 + $0x340] ss:$16 sps:$4 sm:$0xff]  }
  0xdc   : > { %1346 = vmatpush1.bf16.msra.mxu0 %v4548_v55  ;;  %1572 = vmatpush1.bf16.msra.mxu1 %v4549_v56  ;;  %v4643_v55 = vld [vmem:[#allocation5 + $0x348] ss:$16 sps:$4 sm:$0xff]   ;;  %v4648_v56 = vld [vmem:[#allocation5 + $0x364] ss:$16 sps:$4 sm:$0xff]  }
  0xdd   : > { %1347 = vmatprep.subr.bf16.mxu0 %v4550_v57  ;;  %1573 = vmatprep.subr.bf16.mxu1 %v4552_v58  ;;  %v4651_v57 = vld [vmem:[#allocation5 + $0x36c] ss:$16 sps:$4 sm:$0xff]   ;;  %v5514_v58 = vld [vmem:[%s5469_s3 + $0xc4] ss:$16 sps:$4 sm:$0xff]  }
  0xe0   : > { %1348 = vmatpush1.bf16.msra.mxu0 %v4554_v59  ;;  %1574 = vmatpush1.bf16.msra.mxu1 %v4555_v60  ;;  %v4646_v59 = vld [vmem:[#allocation5 + $0x360] ss:$16 sps:$4 sm:$0xff]   ;;  %v4649_v60 = vld [vmem:[#allocation5 + $0x368] ss:$16 sps:$4 sm:$0xff]  }
  0xe1   : > { %1349 = vmatprep.subr.bf16.mxu0 %v4556_v61  ;;  %1575 = vmatprep.subr.bf16.mxu1 %v4558_v62  ;;  %v4657_v61 = vld [vmem:[#allocation5 + $0x384] ss:$16 sps:$4 sm:$0xff]   ;;  %v4660_v62 = vld [vmem:[#allocation5 + $0x38c] ss:$16 sps:$4 sm:$0xff]  }
  0xe4   : > { %1350 = vmatpush1.bf16.msra.mxu0 %v4560_v63  ;;  %1576 = vmatpush1.bf16.msra.mxu1 %v4561_v0  ;;  %v5521_v63 = vld [vmem:[%s5469_s3 + $0xc0] ss:$16 sps:$4 sm:$0xff]  }
  0xe5   : > { %1432 = vmatprep.subr.bf16.mxu0 %v4567_v1  ;;  %1658 = vmatprep.subr.bf16.mxu1 %v4570_v2  ;;  %v4655_v0 = vld [vmem:[#allocation5 + $0x380] ss:$16 sps:$4 sm:$0xff]   ;;  %v4658_v1 = vld [vmem:[#allocation5 + $0x388] ss:$16 sps:$4 sm:$0xff]   ;;  %v4663_v2 = vld [vmem:[#allocation5 + $0x3a4] ss:$16 sps:$4 sm:$0xff]  }
  0xe7   : > { %1352 = vmatmul.mubr.bf16.vlgmr.msra.gmra.mrb[0].mxu0 %v4564_v3  ;;  %1578 = vmatmul.mubr.bf16.vlgmr.msra.gmra.mrb[0].mxu1 %v4564_v3  ;;  %v4666_v3 = vld [vmem:[#allocation5 + $0x3ac] ss:$16 sps:$4 sm:$0xff]  }
  0xe8   : > { %1433 = vmatpush1.bf16.msra.mxu0 %v4565_v4  ;;  %1659 = vmatpush1.bf16.msra.mxu1 %v4568_v5  ;;  %v5524_v4 = vld [vmem:[%s5469_s3 + $0xe4] ss:$16 sps:$4 sm:$0xff]   ;;  %v4661_v5 = vld [vmem:[#allocation5 + $0x3a0] ss:$16 sps:$4 sm:$0xff]  }
  0xe9   : > { %1434 = vmatprep.subr.bf16.mxu0 %v4573_v6  ;;  %1660 = vmatprep.subr.bf16.mxu1 %v4576_v7  ;;  %v4664_v6 = vld [vmem:[#allocation5 + $0x3a8] ss:$16 sps:$4 sm:$0xff]   ;;  %v4672_v7 = vld [vmem:[#allocation5 + $0x3c4] ss:$16 sps:$4 sm:$0xff]  }
  0xea   : > { %1361 = vmatprep.mubr.bf16.mxu0 %v4577_v8  ;;  %1587 = vmatprep.mubr.bf16.mxu1 %v4577_v8  ;;  %v4675_v8 = vld [vmem:[#allocation5 + $0x3cc] ss:$16 sps:$4 sm:$0xff]  }
  0xec   : > { %1435 = vmatpush1.bf16.msra.mxu0 %v4571_v9  ;;  %1661 = vmatpush1.bf16.msra.mxu1 %v4574_v10  ;;  %v5531_v9 = vld [vmem:[%s5469_s3 + $0xe0] ss:$16 sps:$4 sm:$0xff]  }
  0xed   : > { %1436 = vmatprep.subr.bf16.mxu0 %v4582_v11  ;;  %1662 = vmatprep.subr.bf16.mxu1 %v4585_v12  ;;  %v4670_v10 = vld [vmem:[#allocation5 + $0x3c0] ss:$16 sps:$4 sm:$0xff]   ;;  %v4673_v11 = vld [vmem:[#allocation5 + $0x3c8] ss:$16 sps:$4 sm:$0xff]   ;;  %v4678_v12 = vld [vmem:[#allocation5 + $0x3e4] ss:$16 sps:$4 sm:$0xff]  }
  0xef   : > { %1362 = vmatmul.mubr.bf16.gmra.mrb[4].mxu0 %v4579_v13  ;;  %1588 = vmatmul.mubr.bf16.gmra.mrb[4].mxu1 %v4579_v13  ;;  %v4681_v13 = vld [vmem:[#allocation5 + $0x3ec] ss:$16 sps:$4 sm:$0xff]  }
  0xf0   : > { %1437 = vmatpush1.bf16.msra.mxu0 %v4580_v14  ;;  %1663 = vmatpush1.bf16.msra.mxu1 %v4583_v15  ;;  %v5534_v14 = vld [vmem:[%s5469_s3 + $0xc] ss:$16 sps:$4 sm:$0xff]   ;;  %v4676_v15 = vld [vmem:[#allocation5 + $0x3e0] ss:$16 sps:$4 sm:$0xff]  }
  0xf1   : > { %1438 = vmatprep.subr.bf16.mxu0 %v4588_v16  ;;  %1664 = vmatprep.subr.bf16.mxu1 %v4591_v17  ;;  %v4679_v16 = vld [vmem:[#allocation5 + $0x3e8] ss:$16 sps:$4 sm:$0xff]   ;;  %v4687_v17 = vld [vmem:[#allocation7 + $0x4] ss:$8 sps:$4 sm:$0xff]  }
  0xf2   : > { %1371 = vmatprep.mubr.bf16.mxu0 %v4592_v18  ;;  %1597 = vmatprep.mubr.bf16.mxu1 %v4592_v18  ;;  %v4690_v18 = vld [vmem:[#allocation8 + $0x4] ss:$8 sps:$4 sm:$0xff]  }
  0xf4   : > { %1439 = vmatpush1.bf16.msra.mxu0 %v4586_v19  ;;  %1665 = vmatpush1.bf16.msra.mxu1 %v4589_v20  ;;  %v5539_v19 = vld [vmem:[%s5469_s3 + $0x8] ss:$16 sps:$4 sm:$0xff]  }
  0xf5   : > { %1440 = vmatprep.subr.bf16.mxu0 %v4597_v21  ;;  %1666 = vmatprep.subr.bf16.mxu1 %v4600_v22  ;;  %v4685_v20 = vld [vmem:[#allocation7] ss:$8 sps:$4 sm:$0xff]   ;;  %v4693_v22 = vld [vmem:[#allocation7 + $0x14] ss:$8 sps:$4 sm:$0xff]  }
  0xf6   : > { %v4688_v21 = vld [vmem:[#allocation8] ss:$8 sps:$4 sm:$0xff]  }
  0xf7   : > { %1372 = vmatmul.mubr.bf16.gmra.mrb[8].mxu0 %v4594_v23  ;;  %1598 = vmatmul.mubr.bf16.gmra.mrb[8].mxu1 %v4594_v23  ;;  %v4696_v23 = vld [vmem:[#allocation8 + $0x14] ss:$8 sps:$4 sm:$0xff]  }
  0xf8   : > { %1441 = vmatpush1.bf16.msra.mxu0 %v4595_v24  ;;  %1667 = vmatpush1.bf16.msra.mxu1 %v4598_v25  ;;  %v5544_v24 = vld [vmem:[%s5469_s3 + $0x2c] ss:$16 sps:$4 sm:$0xff]   ;;  %v4691_v25 = vld [vmem:[#allocation7 + $0x10] ss:$8 sps:$4 sm:$0xff]  }
  0xf9   : > { %1442 = vmatprep.subr.bf16.mxu0 %v4603_v26  ;;  %1668 = vmatprep.subr.bf16.mxu1 %v4606_v27  ;;  %v4694_v26 = vld [vmem:[#allocation8 + $0x10] ss:$8 sps:$4 sm:$0xff]   ;;  %v4702_v27 = vld [vmem:[#allocation7 + $0x24] ss:$8 sps:$4 sm:$0xff]  }
  0xfa   : > { %1381 = vmatprep.mubr.bf16.mxu0 %v4607_v28  ;;  %1607 = vmatprep.mubr.bf16.mxu1 %v4607_v28  ;;  %v4705_v28 = vld [vmem:[#allocation8 + $0x24] ss:$8 sps:$4 sm:$0xff]  }
  0xfc   : > { %1443 = vmatpush1.bf16.msra.mxu0 %v4601_v29  ;;  %1669 = vmatpush1.bf16.msra.mxu1 %v4604_v30  ;;  %v5551_v29 = vld [vmem:[%s5469_s3 + $0x28] ss:$16 sps:$4 sm:$0xff]  }
  0xfd   : > { %1444 = vmatprep.subr.bf16.mxu0 %v4612_v31  ;;  %1670 = vmatprep.subr.bf16.mxu1 %v4615_v32  ;;  %v4700_v30 = vld [vmem:[#allocation7 + $0x20] ss:$8 sps:$4 sm:$0xff]   ;;  %v4708_v32 = vld [vmem:[#allocation7 + $0x34] ss:$8 sps:$4 sm:$0xff]  }
  0xfe   : > { %v4703_v31 = vld [vmem:[#allocation8 + $0x20] ss:$8 sps:$4 sm:$0xff]  }
  0xff   : > { %1382 = vmatmul.mubr.bf16.gmra.mrb[12].mxu0 %v5491_v33  ;;  %1608 = vmatmul.mubr.bf16.gmra.mrb[12].mxu1 %v5491_v33 }
 0x100   : > { %1445 = vmatpush1.bf16.msra.mxu0 %v4610_v34  ;;  %1671 = vmatpush1.bf16.msra.mxu1 %v4613_v35  ;;  %v4711_v34 = vld [vmem:[#allocation8 + $0x34] ss:$8 sps:$4 sm:$0xff]  }
 0x101   : > { %1446 = vmatprep.subr.bf16.mxu0 %v4618_v36  ;;  %1672 = vmatprep.subr.bf16.mxu1 %v4621_v37  ;;  %v5554_v35 = vld [vmem:[%s5469_s3 + $0x4c] ss:$16 sps:$4 sm:$0xff]   ;;  %v4706_v36 = vld [vmem:[#allocation7 + $0x30] ss:$8 sps:$4 sm:$0xff]  }
 0x102   : > { %1391 = vmatprep.mubr.bf16.mxu0 %v5494_v38  ;;  %1617 = vmatprep.mubr.bf16.mxu1 %v5494_v38  ;;  %v4709_v37 = vld [vmem:[#allocation8 + $0x30] ss:$8 sps:$4 sm:$0xff]  }
 0x104   : > { %1447 = vmatpush1.bf16.msra.mxu0 %v4616_v39  ;;  %1673 = vmatpush1.bf16.msra.mxu1 %v4619_v40  ;;  %v4717_v39 = vld [vmem:[#allocation7 + $0x44] ss:$8 sps:$4 sm:$0xff]  }
 0x105   : > { %1448 = vmatprep.subr.bf16.mxu0 %v4627_v41  ;;  %1674 = vmatprep.subr.bf16.mxu1 %v4630_v42  ;;  %v4720_v40 = vld [vmem:[#allocation8 + $0x44] ss:$8 sps:$4 sm:$0xff]   ;;  %v5561_v41 = vld [vmem:[%s5469_s3 + $0x48] ss:$16 sps:$4 sm:$0xff]  }
 0x106   : > { %v4715_v42 = vld [vmem:[#allocation7 + $0x40] ss:$8 sps:$4 sm:$0xff]  }
 0x107   : > { %1392 = vmatmul.mubr.bf16.gmra.mrb[16].mxu0 %v5501_v43  ;;  %1618 = vmatmul.mubr.bf16.gmra.mrb[16].mxu1 %v5501_v43 }
 0x108   : > { %1449 = vmatpush1.bf16.msra.mxu0 %v4625_v44  ;;  %1675 = vmatpush1.bf16.msra.mxu1 %v4628_v45  ;;  %v4718_v44 = vld [vmem:[#allocation8 + $0x40] ss:$8 sps:$4 sm:$0xff]   ;;  %v4723_v45 = vld [vmem:[#allocation7 + $0x54] ss:$8 sps:$4 sm:$0xff]  }
 0x109   : > { %1450 = vmatprep.subr.bf16.mxu0 %v4633_v46  ;;  %1676 = vmatprep.subr.bf16.mxu1 %v4636_v47  ;;  %v4726_v46 = vld [vmem:[#allocation8 + $0x54] ss:$8 sps:$4 sm:$0xff]  }
 0x10a   : > { %1401 = vmatprep.mubr.bf16.mxu0 %v5504_v48  ;;  %1627 = vmatprep.mubr.bf16.mxu1 %v5504_v48  ;;  %v5564_v47 = vld [vmem:[%s5469_s3 + $0x6c] ss:$16 sps:$4 sm:$0xff]  }
 0x10c   : > { %1451 = vmatpush1.bf16.msra.mxu0 %v4631_v49  ;;  %1677 = vmatpush1.bf16.msra.mxu1 %v4634_v50  ;;  %v4721_v49 = vld [vmem:[#allocation7 + $0x50] ss:$8 sps:$4 sm:$0xff]  }
 0x10d   : > { %1452 = vmatprep.subr.bf16.mxu0 %v4642_v51  ;;  %1678 = vmatprep.subr.bf16.mxu1 %v4645_v52  ;;  %v4724_v50 = vld [vmem:[#allocation8 + $0x50] ss:$8 sps:$4 sm:$0xff]   ;;  %v4732_v51 = vld [vmem:[#allocation7 + $0x64] ss:$8 sps:$4 sm:$0xff]  }
 0x10e   : > { %v4735_v52 = vld [vmem:[#allocation8 + $0x64] ss:$8 sps:$4 sm:$0xff]  }
 0x10f   : > { %1402 = vmatmul.mubr.bf16.gmra.mrb[20].mxu0 %v5511_v53  ;;  %1628 = vmatmul.mubr.bf16.gmra.mrb[20].mxu1 %v5511_v53 }
 0x110   : > { %1453 = vmatpush1.bf16.msra.mxu0 %v4640_v54  ;;  %1679 = vmatpush1.bf16.msra.mxu1 %v4643_v55  ;;  %v5571_v54 = vld [vmem:[%s5469_s3 + $0x68] ss:$16 sps:$4 sm:$0xff]  }
 0x111   : > { %1454 = vmatprep.subr.bf16.mxu0 %v4648_v56  ;;  %1680 = vmatprep.subr.bf16.mxu1 %v4651_v57  ;;  %v4730_v55 = vld [vmem:[#allocation7 + $0x60] ss:$8 sps:$4 sm:$0xff]   ;;  %v4738_v57 = vld [vmem:[#allocation7 + $0x74] ss:$8 sps:$4 sm:$0xff]  }
 0x112   : > { %1411 = vmatprep.mubr.bf16.mxu0 %v5514_v58  ;;  %1637 = vmatprep.mubr.bf16.mxu1 %v5514_v58  ;;  %v4733_v56 = vld [vmem:[#allocation8 + $0x60] ss:$8 sps:$4 sm:$0xff]  }
 0x114   : > { %1455 = vmatpush1.bf16.msra.mxu0 %v4646_v59  ;;  %1681 = vmatpush1.bf16.msra.mxu1 %v4649_v60  ;;  %v4741_v59 = vld [vmem:[#allocation8 + $0x74] ss:$8 sps:$4 sm:$0xff]  }
 0x115   : > { %1456 = vmatprep.subr.bf16.mxu0 %v4657_v61  ;;  %1682 = vmatprep.subr.bf16.mxu1 %v4660_v62  ;;  %v5574_v60 = vld [vmem:[%s5469_s3 + $0x8c] ss:$16 sps:$4 sm:$0xff]   ;;  %v4736_v61 = vld [vmem:[#allocation7 + $0x70] ss:$8 sps:$4 sm:$0xff]  }
 0x116   : > { %v4739_v62 = vld [vmem:[#allocation8 + $0x70] ss:$8 sps:$4 sm:$0xff]  }
 0x117   : > { %1412 = vmatmul.mubr.bf16.gmra.mrb[24].mxu0 %v5521_v63  ;;  %1638 = vmatmul.mubr.bf16.gmra.mrb[24].mxu1 %v5521_v63 }
 0x118   : > { %1457 = vmatpush1.bf16.msra.mxu0 %v4655_v0  ;;  %1683 = vmatpush1.bf16.msra.mxu1 %v4658_v1  ;;  %v4747_v0 = vld [vmem:[#allocation7 + $0x84] ss:$8 sps:$4 sm:$0xff]  }
 0x119   : > { %1458 = vmatprep.subr.bf16.mxu0 %v4663_v2  ;;  %1684 = vmatprep.subr.bf16.mxu1 %v4666_v3  ;;  %v4750_v1 = vld [vmem:[#allocation8 + $0x84] ss:$8 sps:$4 sm:$0xff]   ;;  %v5581_v2 = vld [vmem:[%s5469_s3 + $0x88] ss:$16 sps:$4 sm:$0xff]  }
 0x11a   : > { %1421 = vmatprep.mubr.bf16.mxu0 %v5524_v4  ;;  %1647 = vmatprep.mubr.bf16.mxu1 %v5524_v4  ;;  %v4745_v3 = vld [vmem:[#allocation7 + $0x80] ss:$8 sps:$4 sm:$0xff]  }
 0x11c   : > { %1459 = vmatpush1.bf16.msra.mxu0 %v4661_v5  ;;  %1685 = vmatpush1.bf16.msra.mxu1 %v4664_v6  ;;  %v4748_v5 = vld [vmem:[#allocation8 + $0x80] ss:$8 sps:$4 sm:$0xff]   ;;  %v4753_v6 = vld [vmem:[#allocation7 + $0x94] ss:$8 sps:$4 sm:$0xff]  }
 0x11d   : > { %1460 = vmatprep.subr.bf16.mxu0 %v4672_v7  ;;  %1686 = vmatprep.subr.bf16.mxu1 %v4675_v8  ;;  %v4756_v7 = vld [vmem:[#allocation8 + $0x94] ss:$8 sps:$4 sm:$0xff]  }
 0x11e   : > { %v5584_v8 = vld [vmem:[%s5469_s3 + $0xac] ss:$16 sps:$4 sm:$0xff]  }
 0x11f   : > { %1422 = vmatmul.mubr.bf16.gmra.mrb[28].mxu0 %v5531_v9  ;;  %1648 = vmatmul.mubr.bf16.gmra.mrb[28].mxu1 %v5531_v9 }
 0x120   : > { %1461 = vmatpush1.bf16.msra.mxu0 %v4670_v10  ;;  %1687 = vmatpush1.bf16.msra.mxu1 %v4673_v11  ;;  %v4751_v10 = vld [vmem:[#allocation7 + $0x90] ss:$8 sps:$4 sm:$0xff]  }
 0x121   : > { %1462 = vmatprep.subr.bf16.mxu0 %v4678_v12  ;;  %1688 = vmatprep.subr.bf16.mxu1 %v4681_v13  ;;  %v4754_v11 = vld [vmem:[#allocation8 + $0x90] ss:$8 sps:$4 sm:$0xff]   ;;  %v4762_v12 = vld [vmem:[#allocation7 + $0xa4] ss:$8 sps:$4 sm:$0xff]  }
 0x122   : > { %1464 = vmatprep.mubr.bf16.mxu0 %v5534_v14  ;;  %1690 = vmatprep.mubr.bf16.mxu1 %v5534_v14  ;;  %v4765_v13 = vld [vmem:[#allocation8 + $0xa4] ss:$8 sps:$4 sm:$0xff]  }
 0x124   : > { %1463 = vmatpush1.bf16.msra.mxu0 %v4676_v15  ;;  %1689 = vmatpush1.bf16.msra.mxu1 %v4679_v16  ;;  %v5591_v15 = vld [vmem:[%s5469_s3 + $0xa8] ss:$16 sps:$4 sm:$0xff]  }
 0x125   : > { %2219 = vmatprep.subr.bf16.mxu0 %v4687_v17  ;;  %2829 = vmatprep.subr.bf16.mxu1 %v4690_v18  ;;  %v4760_v16 = vld [vmem:[#allocation7 + $0xa0] ss:$8 sps:$4 sm:$0xff]   ;;  %v4768_v18 = vld [vmem:[#allocation7 + $0xb4] ss:$8 sps:$4 sm:$0xff]  }
 0x126   : > { %v4763_v17 = vld [vmem:[#allocation8 + $0xa0] ss:$8 sps:$4 sm:$0xff]  }
 0x127   : > { %1465 = vmatmul.mubr.bf16.vlgmr.msra.gmra.mrb[0].mxu0 %v5539_v19  ;;  %1691 = vmatmul.mubr.bf16.vlgmr.msra.gmra.mrb[0].mxu1 %v5539_v19 }
 0x128   : > { %2220 = vmatpush1.bf16.msra.mxu0 %v4685_v20  ;;  %2830 = vmatpush1.bf16.msra.mxu1 %v4688_v21  ;;  %v4771_v20 = vld [vmem:[#allocation8 + $0xb4] ss:$8 sps:$4 sm:$0xff]  }
 0x129   : > { %2221 = vmatprep.subr.bf16.mxu0 %v4693_v22  ;;  %2831 = vmatprep.subr.bf16.mxu1 %v4696_v23  ;;  %v5594_v21 = vld [vmem:[%s5469_s3 + $0xcc] ss:$16 sps:$4 sm:$0xff]   ;;  %v4766_v22 = vld [vmem:[#allocation7 + $0xb0] ss:$8 sps:$4 sm:$0xff]  }
 0x12a   : > { %1474 = vmatprep.mubr.bf16.mxu0 %v5544_v24  ;;  %1700 = vmatprep.mubr.bf16.mxu1 %v5544_v24  ;;  %v4769_v23 = vld [vmem:[#allocation8 + $0xb0] ss:$8 sps:$4 sm:$0xff]  }
 0x12c   : > { %2222 = vmatpush1.bf16.msra.mxu0 %v4691_v25  ;;  %2832 = vmatpush1.bf16.msra.mxu1 %v4694_v26  ;;  %v4777_v25 = vld [vmem:[#allocation7 + $0xc4] ss:$8 sps:$4 sm:$0xff]  }
 0x12d   : > { %2223 = vmatprep.subr.bf16.mxu0 %v4702_v27  ;;  %2833 = vmatprep.subr.bf16.mxu1 %v4705_v28  ;;  %v4780_v26 = vld [vmem:[#allocation8 + $0xc4] ss:$8 sps:$4 sm:$0xff]   ;;  %v5601_v27 = vld [vmem:[%s5469_s3 + $0xc8] ss:$16 sps:$4 sm:$0xff]  }
 0x12e   : > { %v4775_v28 = vld [vmem:[#allocation7 + $0xc0] ss:$8 sps:$4 sm:$0xff]  }
 0x12f   : > { %1475 = vmatmul.mubr.bf16.gmra.mrb[4].mxu0 %v5551_v29  ;;  %1701 = vmatmul.mubr.bf16.gmra.mrb[4].mxu1 %v5551_v29 }
 0x130   : > { %2224 = vmatpush1.bf16.msra.mxu0 %v4700_v30  ;;  %2834 = vmatpush1.bf16.msra.mxu1 %v4703_v31  ;;  %v4778_v30 = vld [vmem:[#allocation8 + $0xc0] ss:$8 sps:$4 sm:$0xff]   ;;  %v4783_v31 = vld [vmem:[#allocation7 + $0xd4] ss:$8 sps:$4 sm:$0xff]  }
 0x131   : > { %2225 = vmatprep.subr.bf16.mxu0 %v4708_v32  ;;  %2835 = vmatprep.subr.bf16.mxu1 %v4711_v34  ;;  %v4786_v32 = vld [vmem:[#allocation8 + $0xd4] ss:$8 sps:$4 sm:$0xff]  }
 0x132   : > { %1484 = vmatprep.mubr.bf16.mxu0 %v5554_v35  ;;  %1710 = vmatprep.mubr.bf16.mxu1 %v5554_v35  ;;  %v5604_v34 = vld [vmem:[%s5469_s3 + $0xec] ss:$16 sps:$4 sm:$0xff]  }
 0x134   : > { %2226 = vmatpush1.bf16.msra.mxu0 %v4706_v36  ;;  %2836 = vmatpush1.bf16.msra.mxu1 %v4709_v37  ;;  %v4781_v36 = vld [vmem:[#allocation7 + $0xd0] ss:$8 sps:$4 sm:$0xff]  }
 0x135   : > { %2227 = vmatprep.subr.bf16.mxu0 %v4717_v39  ;;  %2837 = vmatprep.subr.bf16.mxu1 %v4720_v40  ;;  %v4784_v37 = vld [vmem:[#allocation8 + $0xd0] ss:$8 sps:$4 sm:$0xff]   ;;  %v4792_v39 = vld [vmem:[#allocation7 + $0xe4] ss:$8 sps:$4 sm:$0xff]  }
 0x136   : > { %v4795_v40 = vld [vmem:[#allocation8 + $0xe4] ss:$8 sps:$4 sm:$0xff]  }
 0x137   : > { %1485 = vmatmul.mubr.bf16.gmra.mrb[8].mxu0 %v5561_v41  ;;  %1711 = vmatmul.mubr.bf16.gmra.mrb[8].mxu1 %v5561_v41 }
 0x138   : > { %2228 = vmatpush1.bf16.msra.mxu0 %v4715_v42  ;;  %2838 = vmatpush1.bf16.msra.mxu1 %v4718_v44  ;;  %v5611_v42 = vld [vmem:[%s5469_s3 + $0xe8] ss:$16 sps:$4 sm:$0xff]  }
 0x139   : > { %2229 = vmatprep.subr.bf16.mxu0 %v4723_v45  ;;  %2839 = vmatprep.subr.bf16.mxu1 %v4726_v46  ;;  %v4790_v44 = vld [vmem:[#allocation7 + $0xe0] ss:$8 sps:$4 sm:$0xff]   ;;  %v4798_v46 = vld [vmem:[#allocation7 + $0xf4] ss:$8 sps:$4 sm:$0xff]  }
 0x13a   : > { %1494 = vmatprep.mubr.bf16.mxu0 %v5564_v47  ;;  %1720 = vmatprep.mubr.bf16.mxu1 %v5564_v47  ;;  %v4793_v45 = vld [vmem:[#allocation8 + $0xe0] ss:$8 sps:$4 sm:$0xff]  }
 0x13c   : > { %2230 = vmatpush1.bf16.msra.mxu0 %v4721_v49  ;;  %2840 = vmatpush1.bf16.msra.mxu1 %v4724_v50  ;;  %v4801_v49 = vld [vmem:[#allocation8 + $0xf4] ss:$8 sps:$4 sm:$0xff]   ;;  %v4796_v50 = vld [vmem:[#allocation7 + $0xf0] ss:$8 sps:$4 sm:$0xff]  }
 0x13d   : > { %2231 = vmatprep.subr.bf16.mxu0 %v4732_v51  ;;  %2841 = vmatprep.subr.bf16.mxu1 %v4735_v52  ;;  %v4799_v51 = vld [vmem:[#allocation8 + $0xf0] ss:$8 sps:$4 sm:$0xff]   ;;  %v4804_v52 = vld [vmem:[#allocation7 + $0x104] ss:$8 sps:$4 sm:$0xff]  }
 0x13f   : > { %1495 = vmatmul.mubr.bf16.gmra.mrb[12].mxu0 %v5571_v54  ;;  %1721 = vmatmul.mubr.bf16.gmra.mrb[12].mxu1 %v5571_v54 }
 0x140   : > { %2232 = vmatpush1.bf16.msra.mxu0 %v4730_v55  ;;  %2842 = vmatpush1.bf16.msra.mxu1 %v4733_v56  ;;  %v4807_v55 = vld [vmem:[#allocation8 + $0x104] ss:$8 sps:$4 sm:$0xff]  }
 0x141   : > { %2233 = vmatprep.subr.bf16.mxu0 %v4738_v57  ;;  %2843 = vmatprep.subr.bf16.mxu1 %v4741_v59  ;;  %v4898_v56 = vld [vmem:[%s5469_s3 + $0x4] ss:$16 sps:$4 sm:$0xff]   ;;  %v4802_v57 = vld [vmem:[#allocation7 + $0x100] ss:$8 sps:$4 sm:$0xff]  }
 0x142   : > { %1504 = vmatprep.mubr.bf16.mxu0 %v5574_v60  ;;  %1730 = vmatprep.mubr.bf16.mxu1 %v5574_v60  ;;  %v4805_v59 = vld [vmem:[#allocation8 + $0x100] ss:$8 sps:$4 sm:$0xff]  }
 0x144   : > { %2234 = vmatpush1.bf16.msra.mxu0 %v4736_v61  ;;  %2844 = vmatpush1.bf16.msra.mxu1 %v4739_v62  ;;  %v4810_v61 = vld [vmem:[#allocation7 + $0x114] ss:$8 sps:$4 sm:$0xff]  }
 0x145   : > { %2235 = vmatprep.subr.bf16.mxu0 %v4747_v0  ;;  %2845 = vmatprep.subr.bf16.mxu1 %v4750_v1  ;;  %v4813_v62 = vld [vmem:[#allocation8 + $0x114] ss:$8 sps:$4 sm:$0xff]   ;;  %v4899_v0 = vld [vmem:[%s5469_s3] ss:$16 sps:$4 sm:$0xff]  }
 0x146   : > { %v4808_v1 = vld [vmem:[#allocation7 + $0x110] ss:$8 sps:$4 sm:$0xff]  }
 0x147   : > { %1505 = vmatmul.mubr.bf16.gmra.mrb[16].mxu0 %v5581_v2  ;;  %1731 = vmatmul.mubr.bf16.gmra.mrb[16].mxu1 %v5581_v2 }
 0x148   : > { %2236 = vmatpush1.bf16.msra.mxu0 %v4745_v3  ;;  %2846 = vmatpush1.bf16.msra.mxu1 %v4748_v5  ;;  %v4811_v3 = vld [vmem:[#allocation8 + $0x110] ss:$8 sps:$4 sm:$0xff]   ;;  %v4816_v5 = vld [vmem:[#allocation7 + $0x124] ss:$8 sps:$4 sm:$0xff]  }
 0x149   : > { %2237 = vmatprep.subr.bf16.mxu0 %v4753_v6  ;;  %2847 = vmatprep.subr.bf16.mxu1 %v4756_v7  ;;  %v4819_v6 = vld [vmem:[#allocation8 + $0x124] ss:$8 sps:$4 sm:$0xff]  }
 0x14a   : > { %1514 = vmatprep.mubr.bf16.mxu0 %v5584_v8  ;;  %1740 = vmatprep.mubr.bf16.mxu1 %v5584_v8  ;;  %v4900_v7 = vld [vmem:[%s5469_s3 + $0x24] ss:$16 sps:$4 sm:$0xff]  }
 0x14c   : > { %2238 = vmatpush1.bf16.msra.mxu0 %v4751_v10  ;;  %2848 = vmatpush1.bf16.msra.mxu1 %v4754_v11  ;;  %v4814_v10 = vld [vmem:[#allocation7 + $0x120] ss:$8 sps:$4 sm:$0xff]  }
 0x14d   : > { %2239 = vmatprep.subr.bf16.mxu0 %v4762_v12  ;;  %2849 = vmatprep.subr.bf16.mxu1 %v4765_v13  ;;  %v4817_v11 = vld [vmem:[#allocation8 + $0x120] ss:$8 sps:$4 sm:$0xff]   ;;  %v4822_v12 = vld [vmem:[#allocation7 + $0x134] ss:$8 sps:$4 sm:$0xff]  }
 0x14e   : > { %v4825_v13 = vld [vmem:[#allocation8 + $0x134] ss:$8 sps:$4 sm:$0xff]  }
 0x14f   : > { %1515 = vmatmul.mubr.bf16.gmra.mrb[20].mxu0 %v5591_v15  ;;  %1741 = vmatmul.mubr.bf16.gmra.mrb[20].mxu1 %v5591_v15 }
 0x150   : > { %2240 = vmatpush1.bf16.msra.mxu0 %v4760_v16  ;;  %2850 = vmatpush1.bf16.msra.mxu1 %v4763_v17  ;;  %v4901_v16 = vld [vmem:[%s5469_s3 + $0x20] ss:$16 sps:$4 sm:$0xff]  }
 0x151   : > { %2241 = vmatprep.subr.bf16.mxu0 %v4768_v18  ;;  %2851 = vmatprep.subr.bf16.mxu1 %v4771_v20  ;;  %v4820_v17 = vld [vmem:[#allocation7 + $0x130] ss:$8 sps:$4 sm:$0xff]   ;;  %v4828_v20 = vld [vmem:[#allocation7 + $0x144] ss:$8 sps:$4 sm:$0xff]  }
 0x152   : > { %1524 = vmatprep.mubr.bf16.mxu0 %v5594_v21  ;;  %1750 = vmatprep.mubr.bf16.mxu1 %v5594_v21  ;;  %v4823_v18 = vld [vmem:[#allocation8 + $0x130] ss:$8 sps:$4 sm:$0xff]  }
 0x154   : > { %2242 = vmatpush1.bf16.msra.mxu0 %v4766_v22  ;;  %2852 = vmatpush1.bf16.msra.mxu1 %v4769_v23  ;;  %v4831_v22 = vld [vmem:[#allocation8 + $0x144] ss:$8 sps:$4 sm:$0xff]  }
 0x155   : > { %2243 = vmatprep.subr.bf16.mxu0 %v4777_v25  ;;  %2853 = vmatprep.subr.bf16.mxu1 %v4780_v26  ;;  %v4902_v23 = vld [vmem:[%s5469_s3 + $0x44] ss:$16 sps:$4 sm:$0xff]   ;;  %v4826_v25 = vld [vmem:[#allocation7 + $0x140] ss:$8 sps:$4 sm:$0xff]  }
 0x156   : > { %v4829_v26 = vld [vmem:[#allocation8 + $0x140] ss:$8 sps:$4 sm:$0xff]  }
 0x157   : > { %1525 = vmatmul.mubr.bf16.gmra.mrb[24].mxu0 %v5601_v27  ;;  %1751 = vmatmul.mubr.bf16.gmra.mrb[24].mxu1 %v5601_v27 }
 0x158   : > { %2244 = vmatpush1.bf16.msra.mxu0 %v4775_v28  ;;  %2854 = vmatpush1.bf16.msra.mxu1 %v4778_v30  ;;  %v4834_v28 = vld [vmem:[#allocation7 + $0x154] ss:$8 sps:$4 sm:$0xff]  }
 0x159   : > { %2245 = vmatprep.subr.bf16.mxu0 %v4783_v31  ;;  %2855 = vmatprep.subr.bf16.mxu1 %v4786_v32  ;;  %v4837_v30 = vld [vmem:[#allocation8 + $0x154] ss:$8 sps:$4 sm:$0xff]   ;;  %v4903_v31 = vld [vmem:[%s5469_s3 + $0x40] ss:$16 sps:$4 sm:$0xff]  }
 0x15a   : > { %1534 = vmatprep.mubr.bf16.mxu0 %v5604_v34  ;;  %1760 = vmatprep.mubr.bf16.mxu1 %v5604_v34  ;;  %v4832_v32 = vld [vmem:[#allocation7 + $0x150] ss:$8 sps:$4 sm:$0xff]  }
 0x15c   : > { %2246 = vmatpush1.bf16.msra.mxu0 %v4781_v36  ;;  %2856 = vmatpush1.bf16.msra.mxu1 %v4784_v37  ;;  %v4835_v36 = vld [vmem:[#allocation8 + $0x150] ss:$8 sps:$4 sm:$0xff]   ;;  %v4840_v37 = vld [vmem:[#allocation7 + $0x164] ss:$8 sps:$4 sm:$0xff]  }
 0x15d   : > { %2247 = vmatprep.subr.bf16.mxu0 %v4792_v39  ;;  %2857 = vmatprep.subr.bf16.mxu1 %v4795_v40  ;;  %v4843_v39 = vld [vmem:[#allocation8 + $0x164] ss:$8 sps:$4 sm:$0xff]  }
 0x15e   : > { %v4904_v40 = vld [vmem:[%s5469_s3 + $0x64] ss:$16 sps:$4 sm:$0xff]  }
 0x15f   : > { %1535 = vmatmul.mubr.bf16.gmra.mrb[28].mxu0 %v5611_v42  ;;  %1761 = vmatmul.mubr.bf16.gmra.mrb[28].mxu1 %v5611_v42 }
 0x160   : > { %2248 = vmatpush1.bf16.msra.mxu0 %v4790_v44  ;;  %2858 = vmatpush1.bf16.msra.mxu1 %v4793_v45  ;;  %v4838_v44 = vld [vmem:[#allocation7 + $0x160] ss:$8 sps:$4 sm:$0xff]  }
 0x161   : > { %2249 = vmatprep.subr.bf16.mxu0 %v4798_v46  ;;  %2859 = vmatprep.subr.bf16.mxu1 %v4801_v49  ;;  %v4841_v45 = vld [vmem:[#allocation8 + $0x160] ss:$8 sps:$4 sm:$0xff]   ;;  %v4846_v46 = vld [vmem:[#allocation7 + $0x174] ss:$8 sps:$4 sm:$0xff]  }
 0x162   : > { %2251 = vmatprep.mubr.bf16.mxu0 %v4898_v56  ;;  %2861 = vmatprep.mubr.bf16.mxu1 %v4898_v56  ;;  %v4849_v49 = vld [vmem:[#allocation8 + $0x174] ss:$8 sps:$4 sm:$0xff]   ;;  %v4855_v56 = vld [vmem:[#allocation8 + $0x184] ss:$8 sps:$4 sm:$0xff]  }
 0x164   : > { %2250 = vmatpush1.bf16.msra.mxu0 %v4796_v50  ;;  %2860 = vmatpush1.bf16.msra.mxu1 %v4799_v51  ;;  %v4905_v50 = vld [vmem:[%s5469_s3 + $0x60] ss:$16 sps:$4 sm:$0xff]  }
 0x165   : > { %2332 = vmatprep.subr.bf16.mxu0 %v4804_v52  ;;  %2942 = vmatprep.subr.bf16.mxu1 %v4807_v55  ;;  %v4844_v51 = vld [vmem:[#allocation7 + $0x170] ss:$8 sps:$4 sm:$0xff]   ;;  %v4852_v55 = vld [vmem:[#allocation7 + $0x184] ss:$8 sps:$4 sm:$0xff]  }
 0x166   : > { %v4847_v52 = vld [vmem:[#allocation8 + $0x170] ss:$8 sps:$4 sm:$0xff]  }
 0x167   : > { %2252 = vmatmul.mubr.bf16.vlgmr.msra.gmra.mrb[32].mxu0 %v4899_v0  ;;  %2862 = vmatmul.mubr.bf16.vlgmr.msra.gmra.mrb[32].mxu1 %v4899_v0  ;;  %v4859_v0 = vld [vmem:[#allocation8 + $0x190] ss:$8 sps:$4 sm:$0xff]  }
 0x168   : > { %2333 = vmatpush1.bf16.msra.mxu0 %v4802_v57  ;;  %2943 = vmatpush1.bf16.msra.mxu1 %v4805_v59  ;;  %v4850_v57 = vld [vmem:[#allocation7 + $0x180] ss:$8 sps:$4 sm:$0xff]  }
 0x169   : > { %2334 = vmatprep.subr.bf16.mxu0 %v4810_v61  ;;  %2944 = vmatprep.subr.bf16.mxu1 %v4813_v62  ;;  %v4853_v59 = vld [vmem:[#allocation8 + $0x180] ss:$8 sps:$4 sm:$0xff]   ;;  %v4861_v61 = vld [vmem:[#allocation8 + $0x194] ss:$8 sps:$4 sm:$0xff]   ;;  %v4856_v62 = vld [vmem:[#allocation7 + $0x190] ss:$8 sps:$4 sm:$0xff]  }
 0x16a   : > { %2261 = vmatprep.mubr.bf16.mxu0 %v4900_v7  ;;  %2871 = vmatprep.mubr.bf16.mxu1 %v4900_v7  ;;  %v4868_v7 = vld [vmem:[#allocation7 + $0x1b0] ss:$8 sps:$4 sm:$0xff]  }
 0x16c   : > { %2335 = vmatpush1.bf16.msra.mxu0 %v4808_v1  ;;  %2945 = vmatpush1.bf16.msra.mxu1 %v4811_v3  ;;  %v4864_v1 = vld [vmem:[#allocation7 + $0x1a4] ss:$8 sps:$4 sm:$0xff]   ;;  %v4862_v3 = vld [vmem:[#allocation7 + $0x1a0] ss:$8 sps:$4 sm:$0xff]  }
 0x16d   : > { %2336 = vmatprep.subr.bf16.mxu0 %v4816_v5  ;;  %2946 = vmatprep.subr.bf16.mxu1 %v4819_v6  ;;  %v4865_v5 = vld [vmem:[#allocation8 + $0x1a0] ss:$8 sps:$4 sm:$0xff]   ;;  %v4870_v6 = vld [vmem:[#allocation7 + $0x1b4] ss:$8 sps:$4 sm:$0xff]  }
 0x16f   : > { %2262 = vmatmul.mubr.bf16.gmra.mrb[36].mxu0 %v4901_v16  ;;  %2872 = vmatmul.mubr.bf16.gmra.mrb[36].mxu1 %v4901_v16  ;;  %v4882_v16 = vld [vmem:[#allocation7 + $0x1d4] ss:$8 sps:$4 sm:$0xff]  }
 0x170   : > { %2337 = vmatpush1.bf16.msra.mxu0 %v4814_v10  ;;  %2947 = vmatpush1.bf16.msra.mxu1 %v4817_v11  ;;  %v4871_v10 = vld [vmem:[#allocation8 + $0x1b0] ss:$8 sps:$4 sm:$0xff]   ;;  %v4876_v11 = vld [vmem:[#allocation7 + $0x1c4] ss:$8 sps:$4 sm:$0xff]  }
 0x171   : > { %2338 = vmatprep.subr.bf16.mxu0 %v4822_v12  ;;  %2948 = vmatprep.subr.bf16.mxu1 %v4825_v13  ;;  %v4874_v12 = vld [vmem:[#allocation7 + $0x1c0] ss:$8 sps:$4 sm:$0xff]  }
 0x172   : > { %2271 = vmatprep.mubr.bf16.mxu0 %v4902_v23  ;;  %2881 = vmatprep.mubr.bf16.mxu1 %v4902_v23  ;;  %v4877_v13 = vld [vmem:[#allocation8 + $0x1c0] ss:$8 sps:$4 sm:$0xff]  }
 0x173   : > { %v4889_v23 = vld [vmem:[#allocation8 + $0x1e0] ss:$8 sps:$4 sm:$0xff]  }
 0x174   : > { %2339 = vmatpush1.bf16.msra.mxu0 %v4820_v17  ;;  %2949 = vmatpush1.bf16.msra.mxu1 %v4823_v18  ;;  %v4880_v17 = vld [vmem:[#allocation7 + $0x1d0] ss:$8 sps:$4 sm:$0xff]  }
 0x175   : > { %2340 = vmatprep.subr.bf16.mxu0 %v4828_v20  ;;  %2950 = vmatprep.subr.bf16.mxu1 %v4831_v22  ;;  %v4883_v18 = vld [vmem:[#allocation8 + $0x1d0] ss:$8 sps:$4 sm:$0xff]   ;;  %v4888_v20 = vld [vmem:[#allocation7 + $0x1e4] ss:$8 sps:$4 sm:$0xff]   ;;  %v4886_v22 = vld [vmem:[#allocation7 + $0x1e0] ss:$8 sps:$4 sm:$0xff]  }
 0x177   : > { %2272 = vmatmul.mubr.bf16.gmra.mrb[40].mxu0 %v4903_v31  ;;  %2882 = vmatmul.mubr.bf16.gmra.mrb[40].mxu1 %v4903_v31 }
 0x178   : > { %2341 = vmatpush1.bf16.msra.mxu0 %v4826_v25  ;;  %2951 = vmatpush1.bf16.msra.mxu1 %v4829_v26  ;;  %v4894_v25 = vld [vmem:[#allocation7 + $0x1f4] ss:$8 sps:$4 sm:$0xff]   ;;  %v4892_v26 = vld [vmem:[#allocation7 + $0x1f0] ss:$8 sps:$4 sm:$0xff]  }
 0x179   : > { %2342 = vmatprep.subr.bf16.mxu0 %v4834_v28  ;;  %2952 = vmatprep.subr.bf16.mxu1 %v4837_v30  ;;  %v4895_v28 = vld [vmem:[#allocation8 + $0x1f0] ss:$8 sps:$4 sm:$0xff]  }
 0x17a   : > { %2281 = vmatprep.mubr.bf16.mxu0 %v4904_v40  ;;  %2891 = vmatprep.mubr.bf16.mxu1 %v4904_v40 }
 0x17c   : > { %2343 = vmatpush1.bf16.msra.mxu0 %v4832_v32  ;;  %2953 = vmatpush1.bf16.msra.mxu1 %v4835_v36 }
 0x17d   : > { %2344 = vmatprep.subr.bf16.mxu0 %v4840_v37  ;;  %2954 = vmatprep.subr.bf16.mxu1 %v4843_v39 }
 0x17f   : > { %2282 = vmatmul.mubr.bf16.gmra.mrb[44].mxu0 %v5491_v33  ;;  %2892 = vmatmul.mubr.bf16.gmra.mrb[44].mxu1 %v4905_v50  ;;  %v4858_v33 = vld [vmem:[#allocation7 + $0x194] ss:$8 sps:$4 sm:$0xff]  }
 0x180   : > { %2345 = vmatpush1.bf16.msra.mxu0 %v4838_v44  ;;  %2955 = vmatpush1.bf16.msra.mxu1 %v4841_v45 }
 0x181   : > { %2346 = vmatprep.subr.bf16.mxu0 %v4846_v46  ;;  %2956 = vmatprep.subr.bf16.mxu1 %v4849_v49 }
 0x182   : > { %2291 = vmatprep.mubr.bf16.mxu0 %v5494_v38  ;;  %2901 = vmatprep.mubr.bf16.mxu1 %v5494_v38  ;;  %v4867_v38 = vld [vmem:[#allocation8 + $0x1a4] ss:$8 sps:$4 sm:$0xff]  }
 0x184   : > { %2347 = vmatpush1.bf16.msra.mxu0 %v4844_v51  ;;  %2957 = vmatpush1.bf16.msra.mxu1 %v4847_v52 }
 0x185   : > { %2348 = vmatprep.subr.bf16.mxu0 %v4852_v55  ;;  %2958 = vmatprep.subr.bf16.mxu1 %v4855_v56 }
 0x187   : > { %2292 = vmatmul.mubr.bf16.gmra.mrb[48].mxu0 %v5501_v43  ;;  %2902 = vmatmul.mubr.bf16.gmra.mrb[48].mxu1 %v5501_v43  ;;  %v4873_v43 = vld [vmem:[#allocation8 + $0x1b4] ss:$8 sps:$4 sm:$0xff]  }
 0x188   : > { %2349 = vmatpush1.bf16.msra.mxu0 %v4850_v57  ;;  %2959 = vmatpush1.bf16.msra.mxu1 %v4853_v59 }
 0x189   : > { %2350 = vmatprep.subr.bf16.mxu0 %v4858_v33  ;;  %2960 = vmatprep.subr.bf16.mxu1 %v4861_v61 }
 0x18a   : > { %2301 = vmatprep.mubr.bf16.mxu0 %v5504_v48  ;;  %2911 = vmatprep.mubr.bf16.mxu1 %v5504_v48  ;;  %v4879_v48 = vld [vmem:[#allocation8 + $0x1c4] ss:$8 sps:$4 sm:$0xff]  }
 0x18c   : > { %2351 = vmatpush1.bf16.msra.mxu0 %v4856_v62  ;;  %2961 = vmatpush1.bf16.msra.mxu1 %v4859_v0 }
 0x18d   : > { %2352 = vmatprep.subr.bf16.mxu0 %v4864_v1  ;;  %2962 = vmatprep.subr.bf16.mxu1 %v4867_v38 }
 0x18f   : > { %2302 = vmatmul.mubr.bf16.gmra.mrb[52].mxu0 %v5511_v53  ;;  %2912 = vmatmul.mubr.bf16.gmra.mrb[52].mxu1 %v5511_v53  ;;  %v4885_v53 = vld [vmem:[#allocation8 + $0x1d4] ss:$8 sps:$4 sm:$0xff]  }
 0x190   : > { %2353 = vmatpush1.bf16.msra.mxu0 %v4862_v3  ;;  %2963 = vmatpush1.bf16.msra.mxu1 %v4865_v5 }
 0x191   : > { %2354 = vmatprep.subr.bf16.mxu0 %v4870_v6  ;;  %2964 = vmatprep.subr.bf16.mxu1 %v4873_v43 }
 0x192   : > { %2311 = vmatprep.mubr.bf16.mxu0 %v5514_v58  ;;  %2921 = vmatprep.mubr.bf16.mxu1 %v5514_v58  ;;  %v4891_v58 = vld [vmem:[#allocation8 + $0x1e4] ss:$8 sps:$4 sm:$0xff]  }
 0x194   : > { %2355 = vmatpush1.bf16.msra.mxu0 %v4868_v7  ;;  %2965 = vmatpush1.bf16.msra.mxu1 %v4871_v10 }
 0x195   : > { %2356 = vmatprep.subr.bf16.mxu0 %v4876_v11  ;;  %2966 = vmatprep.subr.bf16.mxu1 %v4879_v48 }
 0x197   : > { %2312 = vmatmul.mubr.bf16.gmra.mrb[56].mxu0 %v5521_v63  ;;  %2922 = vmatmul.mubr.bf16.gmra.mrb[56].mxu1 %v5521_v63  ;;  %v4897_v63 = vld [vmem:[#allocation8 + $0x1f4] ss:$8 sps:$4 sm:$0xff]  }
 0x198   : > { %2357 = vmatpush1.bf16.msra.mxu0 %v4874_v12  ;;  %2967 = vmatpush1.bf16.msra.mxu1 %v4877_v13 }
 0x199   : > { %2358 = vmatprep.subr.bf16.mxu0 %v4882_v16  ;;  %2968 = vmatprep.subr.bf16.mxu1 %v4885_v53 }
 0x19a   : > { %2321 = vmatprep.mubr.bf16.mxu0 %v5524_v4  ;;  %2931 = vmatprep.mubr.bf16.mxu1 %v5524_v4 }
 0x19c   : > { %2359 = vmatpush1.bf16.msra.mxu0 %v4880_v17  ;;  %2969 = vmatpush1.bf16.msra.mxu1 %v4883_v18 }
 0x19d   : > { %2360 = vmatprep.subr.bf16.mxu0 %v4888_v20  ;;  %2970 = vmatprep.subr.bf16.mxu1 %v4891_v58 }
 0x19f   : > { %2322 = vmatmul.mubr.bf16.gmra.mrb[60].mxu0 %v5531_v9  ;;  %2932 = vmatmul.mubr.bf16.gmra.mrb[60].mxu1 %v5531_v9 }
 0x1a0   : > { %2361 = vmatpush1.bf16.msra.mxu0 %v4886_v22  ;;  %2971 = vmatpush1.bf16.msra.mxu1 %v4889_v23 }
 0x1a1   : > { %2362 = vmatprep.subr.bf16.mxu0 %v4894_v25  ;;  %2972 = vmatprep.subr.bf16.mxu1 %v4897_v63 }
 0x1a2   : > { %2364 = vmatprep.mubr.bf16.mxu0 %v5534_v14  ;;  %2974 = vmatprep.mubr.bf16.mxu1 %v5534_v14 }
 0x1a4   : > { %2363 = vmatpush1.bf16.msra.mxu0 %v4892_v26  ;;  %2973 = vmatpush1.bf16.msra.mxu1 %v4895_v28 }
 0x1a7   : > { %2365 = vmatmul.mubr.bf16.vlgmr.msra.gmra.mrb[32].mxu0 %v5539_v19  ;;  %2975 = vmatmul.mubr.bf16.vlgmr.msra.gmra.mrb[32].mxu1 %v5539_v19 }
 0x1a8   : > { %2374 = vmatprep.mubr.bf16.mxu0 %v5544_v24  ;;  %2984 = vmatprep.mubr.bf16.mxu1 %v5544_v24 }
 0x1af   : > { %2375 = vmatmul.mubr.bf16.gmra.mrb[36].mxu0 %v5551_v29  ;;  %2985 = vmatmul.mubr.bf16.gmra.mrb[36].mxu1 %v5551_v29 }
 0x1b0   : > { %2384 = vmatprep.mubr.bf16.mxu0 %v5554_v35  ;;  %2994 = vmatprep.mubr.bf16.mxu1 %v5554_v35 }
 0x1b7   : > { %2385 = vmatmul.mubr.bf16.gmra.mrb[40].mxu0 %v5561_v41  ;;  %2995 = vmatmul.mubr.bf16.gmra.mrb[40].mxu1 %v5561_v41 }
 0x1b8   : > { %2394 = vmatprep.mubr.bf16.mxu0 %v5564_v47  ;;  %3004 = vmatprep.mubr.bf16.mxu1 %v5564_v47 }
 0x1bf   : > { %2395 = vmatmul.mubr.bf16.gmra.mrb[44].mxu0 %v5571_v54  ;;  %3005 = vmatmul.mubr.bf16.gmra.mrb[44].mxu1 %v5571_v54 }
 0x1c0   : > { %2404 = vmatprep.mubr.bf16.mxu0 %v5574_v60  ;;  %3014 = vmatprep.mubr.bf16.mxu1 %v5574_v60 }
 0x1c7   : > { %2405 = vmatmul.mubr.bf16.gmra.mrb[48].mxu0 %v5581_v2  ;;  %3015 = vmatmul.mubr.bf16.gmra.mrb[48].mxu1 %v5581_v2 }
 0x1c8   : > { %2414 = vmatprep.mubr.bf16.mxu0 %v5584_v8  ;;  %3024 = vmatprep.mubr.bf16.mxu1 %v5584_v8 }
 0x1cf   : > { %2415 = vmatmul.mubr.bf16.gmra.mrb[52].mxu0 %v5591_v15  ;;  %3025 = vmatmul.mubr.bf16.gmra.mrb[52].mxu1 %v5591_v15 }
 0x1d0   : > { %2424 = vmatprep.mubr.bf16.mxu0 %v5594_v21  ;;  %3034 = vmatprep.mubr.bf16.mxu1 %v5594_v21 }
 0x1d7   : > { %2425 = vmatmul.mubr.bf16.gmra.mrb[56].mxu0 %v5601_v27  ;;  %3035 = vmatmul.mubr.bf16.gmra.mrb[56].mxu1 %v5601_v27 }
 0x1d8   : > { %2434 = vmatprep.mubr.bf16.mxu0 %v5604_v34  ;;  %3044 = vmatprep.mubr.bf16.mxu1 %v5604_v34 }
 0x1df   : > { %2435 = vmatmul.mubr.bf16.gmra.mrb[60].mxu0 %v5611_v42  ;;  %3045 = vmatmul.mubr.bf16.gmra.mrb[60].mxu1 %v5611_v42 }
 0x1fa   : > { %v1466_v4 = vpop.f32.mrb[0].mxu0  ;;  %v1692_v9 = vpop.f32.mrb[0].mxu1 }
 0x1fb   : > { %v1771_v14 = vmul.f32 0.088388346, %v1466_v4  ;;  %v1773_v19 = vmul.f32 0.088388346, %v1692_v9  ;;  %v1468_v24 = vpop.f32.mrb[1].mxu0  ;;  %v1694_v29 = vpop.f32.mrb[1].mxu1 }
 0x1fc   : > { %v1772_v35 = vmul.f32 0.088388346, %v1468_v24  ;;  %v1774_v41 = vmul.f32 0.088388346, %v1694_v29  ;;  %v1470_v47 = vpop.f32.mrb[2].mxu0  ;;  %v1696_v54 = vpop.f32.mrb[2].mxu1 }
 0x1fd   : > { %v1775_v60 = vmul.f32 0.088388346, %v1470_v47  ;;  %v1777_v2 = vmul.f32 0.088388346, %v1696_v54  ;;  %v1472_v8 = vpop.f32.mrb[3].mxu0  ;;  %v1698_v15 = vpop.f32.mrb[3].mxu1 }
 0x1fe   : > { %v4144_v21 = vpack.c.bf16 %v1772_v35, %v1771_v14  ;;  %v4145_v27 = vpack.c.bf16 %v1774_v41, %v1773_v19  ;;  %v1776_v34 = vmul.f32 0.088388346, %v1472_v8  ;;  %v1778_v30 = vmul.f32 0.088388346, %v1698_v15 }
 0x200   : > { %3247 = vst [vmem:[%s5674_s7] sm:$0xff] %v4144_v21  ;;  %3248 = vst [vmem:[%s5674_s7 + $0x8] sm:$0xff] %v4145_v27  ;;  %v4146_v42 = vpack.c.bf16 %v1776_v34, %v1775_v60  ;;  %v4147_v31 = vpack.c.bf16 %v1778_v30, %v1777_v2 }
 0x202   : > { %3249 = vst [vmem:[%s5674_s7 + $0x10] sm:$0xff] %v4146_v42  ;;  %3250 = vst [vmem:[%s5674_s7 + $0x18] sm:$0xff] %v4147_v31  ;;  %v1476_v32 = vpop.f32.mrb[4].mxu0  ;;  %v1702_v36 = vpop.f32.mrb[4].mxu1 }
 0x203   : > { %v1779_v37 = vmul.f32 0.088388346, %v1476_v32  ;;  %v1781_v39 = vmul.f32 0.088388346, %v1702_v36  ;;  %v1478_v40 = vpop.f32.mrb[5].mxu0  ;;  %v1704_v44 = vpop.f32.mrb[5].mxu1 }
 0x204   : > { %v1780_v45 = vmul.f32 0.088388346, %v1478_v40  ;;  %v1782_v46 = vmul.f32 0.088388346, %v1704_v44  ;;  %v1480_v49 = vpop.f32.mrb[6].mxu0  ;;  %v1706_v50 = vpop.f32.mrb[6].mxu1 }
 0x205   : > { %v1783_v51 = vmul.f32 0.088388346, %v1480_v49  ;;  %v1785_v52 = vmul.f32 0.088388346, %v1706_v50  ;;  %v1482_v55 = vpop.f32.mrb[7].mxu0  ;;  %v1708_v56 = vpop.f32.mrb[7].mxu1 }
 0x206   : > { %v4148_v57 = vpack.c.bf16 %v1780_v45, %v1779_v37  ;;  %v4149_v59 = vpack.c.bf16 %v1782_v46, %v1781_v39  ;;  %v1784_v33 = vmul.f32 0.088388346, %v1482_v55  ;;  %v1786_v61 = vmul.f32 0.088388346, %v1708_v56 }
 0x208   : > { %3251 = vst [vmem:[%s5674_s7 + $0x20] sm:$0xff] %v4148_v57  ;;  %3252 = vst [vmem:[%s5674_s7 + $0x28] sm:$0xff] %v4149_v59  ;;  %v4150_v62 = vpack.c.bf16 %v1784_v33, %v1783_v51  ;;  %v4151_v0 = vpack.c.bf16 %v1786_v61, %v1785_v52 }
 0x20a   : > { %3253 = vst [vmem:[%s5674_s7 + $0x30] sm:$0xff] %v4150_v62  ;;  %3254 = vst [vmem:[%s5674_s7 + $0x38] sm:$0xff] %v4151_v0  ;;  %v1486_v1 = vpop.f32.mrb[8].mxu0  ;;  %v1712_v38 = vpop.f32.mrb[8].mxu1 }
 0x20b   : > { %v1787_v3 = vmul.f32 0.088388346, %v1486_v1  ;;  %v1789_v5 = vmul.f32 0.088388346, %v1712_v38  ;;  %v1488_v6 = vpop.f32.mrb[9].mxu0  ;;  %v1714_v43 = vpop.f32.mrb[9].mxu1 }
 0x20c   : > { %v1788_v7 = vmul.f32 0.088388346, %v1488_v6  ;;  %v1790_v10 = vmul.f32 0.088388346, %v1714_v43  ;;  %v1490_v11 = vpop.f32.mrb[10].mxu0  ;;  %v1716_v48 = vpop.f32.mrb[10].mxu1 }
 0x20d   : > { %v1791_v12 = vmul.f32 0.088388346, %v1490_v11  ;;  %v1793_v13 = vmul.f32 0.088388346, %v1716_v48  ;;  %v1492_v16 = vpop.f32.mrb[11].mxu0  ;;  %v1718_v53 = vpop.f32.mrb[11].mxu1 }
 0x20e   : > { %v4152_v17 = vpack.c.bf16 %v1788_v7, %v1787_v3  ;;  %v4153_v18 = vpack.c.bf16 %v1790_v10, %v1789_v5  ;;  %v1792_v20 = vmul.f32 0.088388346, %v1492_v16  ;;  %v1794_v58 = vmul.f32 0.088388346, %v1718_v53 }
 0x210   : > { %3255 = vst [vmem:[%s5674_s7 + $0x40] sm:$0xff] %v4152_v17  ;;  %3256 = vst [vmem:[%s5674_s7 + $0x48] sm:$0xff] %v4153_v18  ;;  %v4154_v22 = vpack.c.bf16 %v1792_v20, %v1791_v12  ;;  %v4155_v23 = vpack.c.bf16 %v1794_v58, %v1793_v13 }
 0x212   : > { %3257 = vst [vmem:[%s5674_s7 + $0x50] sm:$0xff] %v4154_v22  ;;  %3258 = vst [vmem:[%s5674_s7 + $0x58] sm:$0xff] %v4155_v23  ;;  %v1496_v25 = vpop.f32.mrb[12].mxu0  ;;  %v1722_v63 = vpop.f32.mrb[12].mxu1 }
 0x213   : > { %v1795_v26 = vmul.f32 0.088388346, %v1496_v25  ;;  %v1797_v28 = vmul.f32 0.088388346, %v1722_v63  ;;  %v1498_v4 = vpop.f32.mrb[13].mxu0  ;;  %v1724_v9 = vpop.f32.mrb[13].mxu1 }
 0x214   : > { %v1796_v14 = vmul.f32 0.088388346, %v1498_v4  ;;  %v1798_v19 = vmul.f32 0.088388346, %v1724_v9  ;;  %v1500_v24 = vpop.f32.mrb[14].mxu0  ;;  %v1726_v29 = vpop.f32.mrb[14].mxu1 }
 0x215   : > { %v1799_v35 = vmul.f32 0.088388346, %v1500_v24  ;;  %v1801_v41 = vmul.f32 0.088388346, %v1726_v29  ;;  %v1502_v47 = vpop.f32.mrb[15].mxu0  ;;  %v1728_v54 = vpop.f32.mrb[15].mxu1 }
 0x216   : > { %v4156_v60 = vpack.c.bf16 %v1796_v14, %v1795_v26  ;;  %v4157_v2 = vpack.c.bf16 %v1798_v19, %v1797_v28  ;;  %v1800_v8 = vmul.f32 0.088388346, %v1502_v47  ;;  %v1802_v15 = vmul.f32 0.088388346, %v1728_v54 }
 0x218   : > { %3259 = vst [vmem:[%s5674_s7 + $0x60] sm:$0xff] %v4156_v60  ;;  %3260 = vst [vmem:[%s5674_s7 + $0x68] sm:$0xff] %v4157_v2  ;;  %v4158_v21 = vpack.c.bf16 %v1800_v8, %v1799_v35  ;;  %v4159_v27 = vpack.c.bf16 %v1802_v15, %v1801_v41 }
 0x21a   : > { %3261 = vst [vmem:[%s5674_s7 + $0x70] sm:$0xff] %v4158_v21  ;;  %3262 = vst [vmem:[%s5674_s7 + $0x78] sm:$0xff] %v4159_v27  ;;  %v1506_v34 = vpop.f32.mrb[16].mxu0  ;;  %v1732_v30 = vpop.f32.mrb[16].mxu1 }
 0x21b   : > { %v1803_v42 = vmul.f32 0.088388346, %v1506_v34  ;;  %v1805_v31 = vmul.f32 0.088388346, %v1732_v30  ;;  %v1508_v32 = vpop.f32.mrb[17].mxu0  ;;  %v1734_v36 = vpop.f32.mrb[17].mxu1 }
 0x21c   : > { %v1804_v37 = vmul.f32 0.088388346, %v1508_v32  ;;  %v1806_v39 = vmul.f32 0.088388346, %v1734_v36  ;;  %v1510_v40 = vpop.f32.mrb[18].mxu0  ;;  %v1736_v44 = vpop.f32.mrb[18].mxu1 }
 0x21d   : > { %v1807_v45 = vmul.f32 0.088388346, %v1510_v40  ;;  %v1809_v46 = vmul.f32 0.088388346, %v1736_v44  ;;  %v1512_v49 = vpop.f32.mrb[19].mxu0  ;;  %v1738_v50 = vpop.f32.mrb[19].mxu1 }
 0x21e   : > { %v4160_v51 = vpack.c.bf16 %v1804_v37, %v1803_v42  ;;  %v4161_v52 = vpack.c.bf16 %v1806_v39, %v1805_v31  ;;  %v1808_v55 = vmul.f32 0.088388346, %v1512_v49  ;;  %v1810_v56 = vmul.f32 0.088388346, %v1738_v50 }
 0x220   : > { %3263 = vst [vmem:[%s5674_s7 + $0x80] sm:$0xff] %v4160_v51  ;;  %3264 = vst [vmem:[%s5674_s7 + $0x88] sm:$0xff] %v4161_v52  ;;  %v4162_v57 = vpack.c.bf16 %v1808_v55, %v1807_v45  ;;  %v4163_v59 = vpack.c.bf16 %v1810_v56, %v1809_v46 }
 0x222   : > { %3265 = vst [vmem:[%s5674_s7 + $0x90] sm:$0xff] %v4162_v57  ;;  %3266 = vst [vmem:[%s5674_s7 + $0x98] sm:$0xff] %v4163_v59  ;;  %v1516_v33 = vpop.f32.mrb[20].mxu0  ;;  %v1742_v61 = vpop.f32.mrb[20].mxu1 }
 0x223   : > { %v1811_v62 = vmul.f32 0.088388346, %v1516_v33  ;;  %v1813_v0 = vmul.f32 0.088388346, %v1742_v61  ;;  %v1518_v1 = vpop.f32.mrb[21].mxu0  ;;  %v1744_v38 = vpop.f32.mrb[21].mxu1 }
 0x224   : > { %v1812_v3 = vmul.f32 0.088388346, %v1518_v1  ;;  %v1814_v5 = vmul.f32 0.088388346, %v1744_v38  ;;  %v1520_v6 = vpop.f32.mrb[22].mxu0  ;;  %v1746_v43 = vpop.f32.mrb[22].mxu1 }
 0x225   : > { %v1815_v7 = vmul.f32 0.088388346, %v1520_v6  ;;  %v1817_v10 = vmul.f32 0.088388346, %v1746_v43  ;;  %v1522_v11 = vpop.f32.mrb[23].mxu0  ;;  %v1748_v48 = vpop.f32.mrb[23].mxu1 }
 0x226   : > { %v4164_v12 = vpack.c.bf16 %v1812_v3, %v1811_v62  ;;  %v4165_v13 = vpack.c.bf16 %v1814_v5, %v1813_v0  ;;  %v1816_v16 = vmul.f32 0.088388346, %v1522_v11  ;;  %v1818_v53 = vmul.f32 0.088388346, %v1748_v48 }
 0x228   : > { %3267 = vst [vmem:[%s5674_s7 + $0xa0] sm:$0xff] %v4164_v12  ;;  %3268 = vst [vmem:[%s5674_s7 + $0xa8] sm:$0xff] %v4165_v13  ;;  %v4166_v17 = vpack.c.bf16 %v1816_v16, %v1815_v7  ;;  %v4167_v18 = vpack.c.bf16 %v1818_v53, %v1817_v10 }
 0x22a   : > { %3269 = vst [vmem:[%s5674_s7 + $0xb0] sm:$0xff] %v4166_v17  ;;  %3270 = vst [vmem:[%s5674_s7 + $0xb8] sm:$0xff] %v4167_v18  ;;  %v1526_v20 = vpop.f32.mrb[24].mxu0  ;;  %v1752_v58 = vpop.f32.mrb[24].mxu1 }
 0x22b   : > { %v1819_v22 = vmul.f32 0.088388346, %v1526_v20  ;;  %v1821_v23 = vmul.f32 0.088388346, %v1752_v58  ;;  %v1528_v25 = vpop.f32.mrb[25].mxu0  ;;  %v1754_v63 = vpop.f32.mrb[25].mxu1 }
 0x22c   : > { %v1820_v26 = vmul.f32 0.088388346, %v1528_v25  ;;  %v1822_v28 = vmul.f32 0.088388346, %v1754_v63  ;;  %v1530_v4 = vpop.f32.mrb[26].mxu0  ;;  %v1756_v9 = vpop.f32.mrb[26].mxu1 }
 0x22d   : > { %v1823_v14 = vmul.f32 0.088388346, %v1530_v4  ;;  %v1825_v19 = vmul.f32 0.088388346, %v1756_v9  ;;  %v1532_v24 = vpop.f32.mrb[27].mxu0  ;;  %v1758_v29 = vpop.f32.mrb[27].mxu1 }
 0x22e   : > { %v4168_v35 = vpack.c.bf16 %v1820_v26, %v1819_v22  ;;  %v4169_v41 = vpack.c.bf16 %v1822_v28, %v1821_v23  ;;  %v1824_v47 = vmul.f32 0.088388346, %v1532_v24  ;;  %v1826_v54 = vmul.f32 0.088388346, %v1758_v29 }
 0x230   : > { %3271 = vst [vmem:[%s5674_s7 + $0xc0] sm:$0xff] %v4168_v35  ;;  %3272 = vst [vmem:[%s5674_s7 + $0xc8] sm:$0xff] %v4169_v41  ;;  %v4170_v60 = vpack.c.bf16 %v1824_v47, %v1823_v14  ;;  %v4171_v2 = vpack.c.bf16 %v1826_v54, %v1825_v19 }
 0x232   : > { %3273 = vst [vmem:[%s5674_s7 + $0xd0] sm:$0xff] %v4170_v60  ;;  %3274 = vst [vmem:[%s5674_s7 + $0xd8] sm:$0xff] %v4171_v2  ;;  %v1536_v8 = vpop.f32.mrb[28].mxu0  ;;  %v1762_v15 = vpop.f32.mrb[28].mxu1 }
 0x233   : > { %v1827_v21 = vmul.f32 0.088388346, %v1536_v8  ;;  %v1829_v27 = vmul.f32 0.088388346, %v1762_v15  ;;  %v1538_v34 = vpop.f32.mrb[29].mxu0  ;;  %v1764_v30 = vpop.f32.mrb[29].mxu1 }
 0x234   : > { %v1828_v42 = vmul.f32 0.088388346, %v1538_v34  ;;  %v1830_v31 = vmul.f32 0.088388346, %v1764_v30  ;;  %v1540_v32 = vpop.f32.mrb[30].mxu0  ;;  %v1766_v36 = vpop.f32.mrb[30].mxu1 }
 0x235   : > { %v1831_v37 = vmul.f32 0.088388346, %v1540_v32  ;;  %v1833_v39 = vmul.f32 0.088388346, %v1766_v36  ;;  %v1542_v40 = vpop.f32.mrb[31].mxu0  ;;  %v1768_v44 = vpop.f32.mrb[31].mxu1 }
 0x236   : > { %v4172_v45 = vpack.c.bf16 %v1828_v42, %v1827_v21  ;;  %v4173_v46 = vpack.c.bf16 %v1830_v31, %v1829_v27  ;;  %v1832_v49 = vmul.f32 0.088388346, %v1542_v40  ;;  %v1834_v50 = vmul.f32 0.088388346, %v1768_v44 }
 0x238   : > { %3275 = vst [vmem:[%s5674_s7 + $0xe0] sm:$0xff] %v4172_v45  ;;  %3276 = vst [vmem:[%s5674_s7 + $0xe8] sm:$0xff] %v4173_v46  ;;  %v4174_v51 = vpack.c.bf16 %v1832_v49, %v1831_v37  ;;  %v4175_v52 = vpack.c.bf16 %v1834_v50, %v1833_v39 }
 0x23a   : > { %3277 = vst [vmem:[%s5674_s7 + $0xf0] sm:$0xff] %v4174_v51  ;;  %3278 = vst [vmem:[%s5674_s7 + $0xf8] sm:$0xff] %v4175_v52 }
 0x23b   : > { %5033 = shalt.err (!%p5030_p2)
}
 0x23c   : > { %s5034_s8 = scalar_lea.hbm %s5716_s6, 4096  ;;  %s5038_s7 = scalar_lea.hbm %s5884_s4, 16384 }
 0x23d   : > { %p5035_p5 = scmp.ne.s32.totalorder %s5716_s6, %s5034_s8  ;;  %p5039_p4 = scmp.lt.u32.totalorder %s5716_s6, %s5884_s4 }
 0x23e   : > { %p5040_p6 = scmp.lt.u32.totalorder %s5038_s7, %s5034_s8  ;;  %p5042_p11 = scmp.lt.u32.totalorder %s5034_s8, %s5716_s6 }
 0x23f   : > { %p5036_p9 = pnand %p5035_p5, %p5395_p8 }
 0x240   : > { %p5041_p10 = por %p5040_p6, %p5039_p4 }
 0x241   : > { %p5037_p0 = pneg %p5036_p9 }
 0x242   : > { %p5043_p13 = por %p5042_p11, %p5041_p10 }
 0x244   : > { %p5044_p3 = pnand %p5043_p13, %p5037_p0 }
 0x246   : > { %5047 = shalt.err (!%p5044_p3)
}
 0x247   : > { %s5197_s20 = smov 256   ;;  %s5198_s12 = smov 16  }
 0x248   : > { %4353 = dma.vmem_to_hbm [thread:$0]  (%p5395_p8), %s5711_s18, 4096, %s5716_s6, %s3504_s10, %s5197_s20, %s5197_s20, %s5198_s12  }
 0x249   : > { %s3772_s2 = sshll.u32 %s5463_s17, 7  ;;  %s4209_s17 = sshll.u32 %s5170_s24, 5 }
 0x24a   : > { %s5743_s19 = scalar_lea.vmem [#allocation11], %s3772_s2  ;;  %s5746_s13 = scalar_lea.vmem [#allocation13], %s3772_s2 }
 0x24b   : > { %s4135_s18 = sshll.u32 %s5174_s25, 6  ;;  %s3508_s10 = sand.u32 1, %s5279_s29  }
 0x24c   : > { %s3546_s6 = sadd.s32 %s4209_s17, %s4135_s18  ;;  %s3549_s11 = sshll.u32 %s5743_s19, 4  ;;  %s5785_s11 = int_to_ptr.vmem [resolvable:$true] %s3549_s11 }
 0x24d   : > { %s4136_s15 = sshll.u32 %s3546_s6, 6  ;;  %s3568_s24 = sshll.u32 %s5746_s13, 4  ;;  %s5794_s24 = int_to_ptr.vmem [resolvable:$true] %s3568_s24 }
 0x24e   : > { %s5783_s21 = scalar_lea.hbm %s5885_s5, %s4136_s15  ;;  %s5926_s3 = sld [smem:[#allocation26_spill]] }
 0x24f   : > { %s5798_s9 = scalar_lea.sflag [#allocation12], %s3508_s10  ;;  %s5048_s14 = scalar_lea.vmem %s5785_s11, 2048 }
 0x250   : > { %p5049_p7 = scmp.ne.s32.totalorder %s5785_s11, %s5048_s14  ;;  %s5199_s20 = smov [#allocation11]  }
 0x251   : > { %s5052_s12 = sshll.u32 %s5199_s20, 4  ;;  %s5053_s12 = int_to_ptr.vmem [resolvable:$false] %s5052_s12 }
 0x252   : > { %p5050_p12 = pnand %p5049_p7, %p5395_p8  ;;  %s5054_s2 = scalar_lea.vmem %s5053_s12, 4096 }
 0x253   : > { %p5055_p2 = scmp.lt.s32.totalorder %s5785_s11, %s5053_s12  ;;  %p5056_p5 = scmp.lt.s32.totalorder %s5054_s2, %s5048_s14 }
 0x254   : > { %s5792_s7 = scalar_lea.hbm %s5926_s3, %s4136_s15  ;;  %p5051_p1 = pneg %p5050_p12 }
 0x255   : > { %p5057_p9 = por %p5056_p5, %p5055_p2 }
 0x257   : > { %p5058_p0 = pnand %p5057_p9, %p5051_p1 }
 0x27a   : > { %v2366_v55 = vpop.f32.mrb[32].mxu0  ;;  %v2976_v56 = vpop.f32.mrb[32].mxu1 }
 0x27b   : > { %v2368_v57 = vpop.f32.mrb[33].mxu0  ;;  %v2978_v59 = vpop.f32.mrb[33].mxu1 }
 0x27c   : > { %v4176_v33 = vpack.c.bf16 %v2368_v57, %v2366_v55  ;;  %v4192_v61 = vpack.c.bf16 %v2978_v59, %v2976_v56  ;;  %v2370_v62 = vpop.f32.mrb[34].mxu0  ;;  %v2980_v0 = vpop.f32.mrb[34].mxu1 }
 0x27d   : > { %v2372_v1 = vpop.f32.mrb[35].mxu0  ;;  %v2982_v38 = vpop.f32.mrb[35].mxu1 }
 0x27e   : > { %3375 = vst [vmem:[%s5743_s19] sm:$0xff] %v4176_v33  ;;  %3487 = vst [vmem:[%s5746_s13] sm:$0xff] %v4192_v61  ;;  %v4177_v3 = vpack.c.bf16 %v2372_v1, %v2370_v62  ;;  %v4193_v5 = vpack.c.bf16 %v2982_v38, %v2980_v0 }
 0x280   : > { %3376 = vst [vmem:[%s5743_s19 + $0x8] sm:$0xff] %v4177_v3  ;;  %3488 = vst [vmem:[%s5746_s13 + $0x8] sm:$0xff] %v4193_v5 }
 0x282   : > { %v2376_v6 = vpop.f32.mrb[36].mxu0  ;;  %v2986_v43 = vpop.f32.mrb[36].mxu1 }
 0x283   : > { %v2378_v7 = vpop.f32.mrb[37].mxu0  ;;  %v2988_v10 = vpop.f32.mrb[37].mxu1 }
 0x284   : > { %v4178_v11 = vpack.c.bf16 %v2378_v7, %v2376_v6  ;;  %v4194_v48 = vpack.c.bf16 %v2988_v10, %v2986_v43  ;;  %v2380_v12 = vpop.f32.mrb[38].mxu0  ;;  %v2990_v13 = vpop.f32.mrb[38].mxu1 }
 0x285   : > { %v2382_v16 = vpop.f32.mrb[39].mxu0  ;;  %v2992_v53 = vpop.f32.mrb[39].mxu1 }
 0x286   : > { %3377 = vst [vmem:[%s5743_s19 + $0x10] sm:$0xff] %v4178_v11  ;;  %3489 = vst [vmem:[%s5746_s13 + $0x10] sm:$0xff] %v4194_v48  ;;  %v4179_v17 = vpack.c.bf16 %v2382_v16, %v2380_v12  ;;  %v4195_v18 = vpack.c.bf16 %v2992_v53, %v2990_v13 }
 0x288   : > { %3378 = vst [vmem:[%s5743_s19 + $0x18] sm:$0xff] %v4179_v17  ;;  %3490 = vst [vmem:[%s5746_s13 + $0x18] sm:$0xff] %v4195_v18 }
 0x28a   : > { %v2386_v20 = vpop.f32.mrb[40].mxu0  ;;  %v2996_v58 = vpop.f32.mrb[40].mxu1 }
 0x28b   : > { %v2388_v22 = vpop.f32.mrb[41].mxu0  ;;  %v2998_v23 = vpop.f32.mrb[41].mxu1 }
 0x28c   : > { %v4180_v25 = vpack.c.bf16 %v2388_v22, %v2386_v20  ;;  %v4196_v63 = vpack.c.bf16 %v2998_v23, %v2996_v58  ;;  %v2390_v26 = vpop.f32.mrb[42].mxu0  ;;  %v3000_v28 = vpop.f32.mrb[42].mxu1 }
 0x28d   : > { %v2392_v4 = vpop.f32.mrb[43].mxu0  ;;  %v3002_v9 = vpop.f32.mrb[43].mxu1 }
 0x28e   : > { %3379 = vst [vmem:[%s5743_s19 + $0x20] sm:$0xff] %v4180_v25  ;;  %3491 = vst [vmem:[%s5746_s13 + $0x20] sm:$0xff] %v4196_v63  ;;  %v4181_v14 = vpack.c.bf16 %v2392_v4, %v2390_v26  ;;  %v4197_v19 = vpack.c.bf16 %v3002_v9, %v3000_v28 }
 0x290   : > { %3380 = vst [vmem:[%s5743_s19 + $0x28] sm:$0xff] %v4181_v14  ;;  %3492 = vst [vmem:[%s5746_s13 + $0x28] sm:$0xff] %v4197_v19 }
 0x292   : > { %v2396_v24 = vpop.f32.mrb[44].mxu0  ;;  %v3006_v29 = vpop.f32.mrb[44].mxu1 }
 0x293   : > { %v2398_v35 = vpop.f32.mrb[45].mxu0  ;;  %v3008_v41 = vpop.f32.mrb[45].mxu1 }
 0x294   : > { %v4182_v47 = vpack.c.bf16 %v2398_v35, %v2396_v24  ;;  %v4198_v54 = vpack.c.bf16 %v3008_v41, %v3006_v29  ;;  %v2400_v60 = vpop.f32.mrb[46].mxu0  ;;  %v3010_v2 = vpop.f32.mrb[46].mxu1 }
 0x295   : > { %v2402_v8 = vpop.f32.mrb[47].mxu0  ;;  %v3012_v15 = vpop.f32.mrb[47].mxu1 }
 0x296   : > { %3381 = vst [vmem:[%s5743_s19 + $0x30] sm:$0xff] %v4182_v47  ;;  %3493 = vst [vmem:[%s5746_s13 + $0x30] sm:$0xff] %v4198_v54  ;;  %v4183_v21 = vpack.c.bf16 %v2402_v8, %v2400_v60  ;;  %v4199_v27 = vpack.c.bf16 %v3012_v15, %v3010_v2 }
 0x298   : > { %3382 = vst [vmem:[%s5743_s19 + $0x38] sm:$0xff] %v4183_v21  ;;  %3494 = vst [vmem:[%s5746_s13 + $0x38] sm:$0xff] %v4199_v27 }
 0x29a   : > { %v2406_v34 = vpop.f32.mrb[48].mxu0  ;;  %v3016_v30 = vpop.f32.mrb[48].mxu1 }
 0x29b   : > { %v2408_v42 = vpop.f32.mrb[49].mxu0  ;;  %v3018_v31 = vpop.f32.mrb[49].mxu1 }
 0x29c   : > { %v4184_v32 = vpack.c.bf16 %v2408_v42, %v2406_v34  ;;  %v4200_v36 = vpack.c.bf16 %v3018_v31, %v3016_v30  ;;  %v2410_v37 = vpop.f32.mrb[50].mxu0  ;;  %v3020_v39 = vpop.f32.mrb[50].mxu1 }
 0x29d   : > { %v2412_v40 = vpop.f32.mrb[51].mxu0  ;;  %v3022_v44 = vpop.f32.mrb[51].mxu1 }
 0x29e   : > { %3383 = vst [vmem:[%s5743_s19 + $0x40] sm:$0xff] %v4184_v32  ;;  %3495 = vst [vmem:[%s5746_s13 + $0x40] sm:$0xff] %v4200_v36  ;;  %v4185_v45 = vpack.c.bf16 %v2412_v40, %v2410_v37  ;;  %v4201_v46 = vpack.c.bf16 %v3022_v44, %v3020_v39 }
 0x2a0   : > { %3384 = vst [vmem:[%s5743_s19 + $0x48] sm:$0xff] %v4185_v45  ;;  %3496 = vst [vmem:[%s5746_s13 + $0x48] sm:$0xff] %v4201_v46 }
 0x2a2   : > { %v2416_v49 = vpop.f32.mrb[52].mxu0  ;;  %v3026_v50 = vpop.f32.mrb[52].mxu1 }
 0x2a3   : > { %v2418_v51 = vpop.f32.mrb[53].mxu0  ;;  %v3028_v52 = vpop.f32.mrb[53].mxu1 }
 0x2a4   : > { %v4186_v55 = vpack.c.bf16 %v2418_v51, %v2416_v49  ;;  %v4202_v56 = vpack.c.bf16 %v3028_v52, %v3026_v50  ;;  %v2420_v57 = vpop.f32.mrb[54].mxu0  ;;  %v3030_v59 = vpop.f32.mrb[54].mxu1 }
 0x2a5   : > { %v2422_v33 = vpop.f32.mrb[55].mxu0  ;;  %v3032_v61 = vpop.f32.mrb[55].mxu1 }
 0x2a6   : > { %3385 = vst [vmem:[%s5743_s19 + $0x50] sm:$0xff] %v4186_v55  ;;  %3497 = vst [vmem:[%s5746_s13 + $0x50] sm:$0xff] %v4202_v56  ;;  %v4187_v62 = vpack.c.bf16 %v2422_v33, %v2420_v57  ;;  %v4203_v0 = vpack.c.bf16 %v3032_v61, %v3030_v59 }
 0x2a8   : > { %3386 = vst [vmem:[%s5743_s19 + $0x58] sm:$0xff] %v4187_v62  ;;  %3498 = vst [vmem:[%s5746_s13 + $0x58] sm:$0xff] %v4203_v0 }
 0x2aa   : > { %v2426_v1 = vpop.f32.mrb[56].mxu0  ;;  %v3036_v38 = vpop.f32.mrb[56].mxu1 }
 0x2ab   : > { %v2428_v3 = vpop.f32.mrb[57].mxu0  ;;  %v3038_v5 = vpop.f32.mrb[57].mxu1 }
 0x2ac   : > { %v4188_v6 = vpack.c.bf16 %v2428_v3, %v2426_v1  ;;  %v4204_v43 = vpack.c.bf16 %v3038_v5, %v3036_v38  ;;  %v2430_v7 = vpop.f32.mrb[58].mxu0  ;;  %v3040_v10 = vpop.f32.mrb[58].mxu1 }
 0x2ad   : > { %v2432_v11 = vpop.f32.mrb[59].mxu0  ;;  %v3042_v48 = vpop.f32.mrb[59].mxu1 }
 0x2ae   : > { %3387 = vst [vmem:[%s5743_s19 + $0x60] sm:$0xff] %v4188_v6  ;;  %3499 = vst [vmem:[%s5746_s13 + $0x60] sm:$0xff] %v4204_v43  ;;  %v4189_v12 = vpack.c.bf16 %v2432_v11, %v2430_v7  ;;  %v4205_v13 = vpack.c.bf16 %v3042_v48, %v3040_v10 }
 0x2b0   : > { %3388 = vst [vmem:[%s5743_s19 + $0x68] sm:$0xff] %v4189_v12  ;;  %3500 = vst [vmem:[%s5746_s13 + $0x68] sm:$0xff] %v4205_v13 }
 0x2b2   : > { %v2436_v16 = vpop.f32.mrb[60].mxu0  ;;  %v3046_v53 = vpop.f32.mrb[60].mxu1 }
 0x2b3   : > { %v2438_v17 = vpop.f32.mrb[61].mxu0  ;;  %v3048_v18 = vpop.f32.mrb[61].mxu1 }
 0x2b4   : > { %v4190_v20 = vpack.c.bf16 %v2438_v17, %v2436_v16  ;;  %v4206_v58 = vpack.c.bf16 %v3048_v18, %v3046_v53  ;;  %v2440_v22 = vpop.f32.mrb[62].mxu0  ;;  %v3050_v23 = vpop.f32.mrb[62].mxu1 }
 0x2b5   : > { %v2442_v25 = vpop.f32.mrb[63].mxu0  ;;  %v3052_v63 = vpop.f32.mrb[63].mxu1 }
 0x2b6   : > { %3389 = vst [vmem:[%s5743_s19 + $0x70] sm:$0xff] %v4190_v20  ;;  %3501 = vst [vmem:[%s5746_s13 + $0x70] sm:$0xff] %v4206_v58  ;;  %v4191_v26 = vpack.c.bf16 %v2442_v25, %v2440_v22  ;;  %v4207_v28 = vpack.c.bf16 %v3052_v63, %v3050_v23 }
 0x2b8   : > { %3390 = vst [vmem:[%s5743_s19 + $0x78] sm:$0xff] %v4191_v26  ;;  %3502 = vst [vmem:[%s5746_s13 + $0x78] sm:$0xff] %v4207_v28 }
 0x2b9   : > { %5061 = shalt.err (!%p5058_p0)
}
 0x2ba   : > { %s5062_s19 = scalar_lea.hbm %s5783_s21, 2048  ;;  %s5066_s18 = scalar_lea.hbm %s5885_s5, 8192 }
 0x2bb   : > { %p5063_p4 = scmp.ne.s32.totalorder %s5783_s21, %s5062_s19  ;;  %p5067_p11 = scmp.lt.u32.totalorder %s5783_s21, %s5885_s5 }
 0x2bc   : > { %p5068_p13 = scmp.lt.u32.totalorder %s5066_s18, %s5062_s19  ;;  %p5070_p7 = scmp.lt.u32.totalorder %s5062_s19, %s5783_s21 }
 0x2bd   : > { %p5064_p6 = pnand %p5063_p4, %p5395_p8 }
 0x2be   : > { %p5069_p3 = por %p5068_p13, %p5067_p11 }
 0x2bf   : > { %p5065_p10 = pneg %p5064_p6 }
 0x2c0   : > { %p5071_p12 = por %p5070_p7, %p5069_p3 }
 0x2c2   : > { %p5072_p1 = pnand %p5071_p12, %p5065_p10 }
 0x2c4   : > { %5075 = shalt.err (!%p5072_p1)
}
 0x2c5   : > { %s5200_s15 = smov 128   ;;  %s5201_s25 = smov 8  }
 0x2c6   : > { %4354 = dma.vmem_to_hbm [thread:$0]  (%p5395_p8), %s5785_s11, 2048, %s5783_s21, %s5798_s9, %s5200_s15, %s5200_s15, %s5201_s25  }
 0x2c7   : > { %s5076_s29 = scalar_lea.vmem %s5794_s24, 2048  ;;  %s5202_s8 = smov [#allocation13]  }
 0x2c8   : > { %p5077_p2 = scmp.ne.s32.totalorder %s5794_s24, %s5076_s29  ;;  %s5080_s1 = sshll.u32 %s5202_s8, 4  ;;  %s5081_s1 = int_to_ptr.vmem [resolvable:$false] %s5080_s1 }
 0x2c9   : > { %s5082_s14 = scalar_lea.vmem %s5081_s1, 4096  ;;  %p5083_p0 = scmp.lt.s32.totalorder %s5794_s24, %s5081_s1 }
 0x2ca   : > { %p5078_p5 = pnand %p5077_p2, %p5395_p8  ;;  %p5084_p4 = scmp.lt.s32.totalorder %s5082_s14, %s5076_s29 }
 0x2cc   : > { %p5079_p9 = pneg %p5078_p5  ;;  %p5085_p6 = por %p5084_p4, %p5083_p0 }
 0x2ce   : > { %p5086_p10 = pnand %p5085_p6, %p5079_p9 }
 0x2d0   : > { %5089 = shalt.err (!%p5086_p10)
}
 0x2d1   : > { %s5090_s11 = scalar_lea.hbm %s5792_s7, 2048  ;;  %s5094_s12 = scalar_lea.hbm %s5926_s3, 8192 }
 0x2d2   : > { %p5091_p11 = scmp.ne.s32.totalorder %s5792_s7, %s5090_s11  ;;  %p5095_p7 = scmp.lt.u32.totalorder %s5792_s7, %s5926_s3 }
 0x2d3   : > { %p5096_p12 = scmp.lt.u32.totalorder %s5094_s12, %s5090_s11  ;;  %p5098_p2 = scmp.lt.u32.totalorder %s5090_s11, %s5792_s7 }
 0x2d4   : > { %p5092_p13 = pnand %p5091_p11, %p5395_p8 }
 0x2d5   : > { %p5097_p1 = por %p5096_p12, %p5095_p7 }
 0x2d6   : > { %p5093_p3 = pneg %p5092_p13 }
 0x2d7   : > { %p5099_p5 = por %p5098_p2, %p5097_p1 }
 0x2d9   : > { %p5100_p9 = pnand %p5099_p5, %p5093_p3 }
 0x2db   : > { %5103 = shalt.err (!%p5100_p9)
}
 0x2dc   : > { %4355 = dma.vmem_to_hbm [thread:$0]  (%p5395_p8), %s5794_s24, 2048, %s5792_s7, %s5798_s9, %s5200_s15, %s5200_s15, %s5201_s25  }
 0x2dd PF: > { %s5927_s13 = sld [smem:[#allocation19_spill]]  ;;  %s5928_s17 = sld [smem:[#allocation20_spill]] }
 0x2de   : > { %p4390_p0 = scmp.ge.s32.totalorder %s5186_s28, 2 }
 0x2e3   : > { %s3583_s18 = sand.u32 1, %s5927_s13   ;;  %p5929_p4 = scmp.ne.s32.totalorder %s5928_s17, 0 }
 0x2e4   : > { %s3584_s6 = scalar_lea.sflag [#allocation4], %s3583_s18 }
 0x2e5   : > { %p4374_p6 = pnand %p4390_p0, %p5929_p4 }
 0x2e7   : > { %5149 = dma.done.wait (!%p4374_p6), %s3584_s6, 4096  }
 0x2e8   : > { %5151 = vsyncadd (!%p4374_p6), %s3584_s6, 4294963200  ;;  %s5930_s30 = sadd.s32 4294967294, %s5186_s28  }
 0x2e9   : > { %s3592_s10 = sand.u32 1, %s5930_s30  }
 0x2ea   : > { %s3593_s29 = scalar_lea.sflag [#allocation12], %s3592_s10 }
 0x2eb   : > { %5153 = dma.done.wait (!%p4374_p6), %s3593_s29, 4096  }
 0x2ec   : > { %5155 = vsyncadd (!%p4374_p6), %s3593_s29, 4294963200  ;;  %s28_s28 = sadd.s32 1, %s5186_s28   ;;  %s5931_s7 = sld [smem:[#allocation21_spill]] }
 0x2ed   : > { %p25_p8 = scmp.ge.s32.totalorder %s28_s28, 6   ;;  %s5932_s9 = sld [smem:[#allocation22_spill]] }
 0x2ee   : > { %s5933_s21 = smov %s5162_s22  ;;  %s5934_s22 = smov %s5166_s23 }
 0x2ef   : > { %s5935_s23 = smov %s5412_s16  ;;  %s5936_s24 = smov %s5178_s26 }
 0x2f0   : > { %s5937_s25 = smov %s5182_s27  ;;  %27 = sbr.rel (!%p25_p8) target bundleno = 16 (0x10), region = 125 }
 0x2f2   : > { %s5938_s26 = smov %s5931_s7 }
 0x2f3   : > { %s5939_s27 = smov %s5932_s9 }
 0x2f7   :  { %3607 = vsyncpa [#allocation3], 1 }
 0x2f8   :  { %3609 = vsyncpa [#allocation3 + $0x1], 1 }
 0x2f9   :  { %3610 = vsyncpa [#allocation6], 1 }
 0x2fa   :  { %3611 = vsyncpa [#allocation9], 1 }
 0x2fb   :  { %3612 = vsyncpa [#allocation4], 1 }
 0x2fc   :  { %3614 = vsyncpa [#allocation4 + $0x1], 1 }
 0x2fd   :  { %3615 = vsyncpa [#allocation12], 1 }
 0x2fe   :  { %3617 = vsyncpa [#allocation12 + $0x1], 1 }

</bundles_post_ra>
